<compile_context>
chip_gen: v7x
topology: tpu7x:2x2x1
jax: 0.10.0
libtpu: 0.0.40
codegen_flags: <defaults>
</compile_context>

<pallas_src>
import jax
import jax.numpy as jnp
from jax.experimental import pallas as pl
from jax.experimental.pallas import tpu as pltpu


def _round_up(n, m):
    return (n + m - 1) // m * m


def _pad2(a, rows, cols):
    r, c = a.shape
    return jnp.pad(a, ((0, rows - r), (0, cols - c)))


def vae_kernel(x_ref, eps_ref,
               ew0_ref, eb0_ref, ew1_ref, eb1_ref,
               ew2m_ref, eb2m_ref, ew2v_ref, eb2v_ref,
               dw0_ref, db0_ref, dw1_ref, db1_ref, dw2_ref, db2_ref,
               recon_ref, mu_ref, logvar_ref):
    f32 = jnp.float32
    bf16 = jnp.bfloat16

    # ---------------- encoder (bf16 matmuls, f32 accumulate) ----------------
    x = x_ref[...].astype(bf16)                 # in-VMEM cast (input may be f32)
    h = jnp.dot(x, ew0_ref[...], preferred_element_type=f32) + eb0_ref[...]
    h = jnp.maximum(h, 0.0)                     # ReLU
    h = jnp.dot(h.astype(bf16), ew1_ref[...], preferred_element_type=f32) + eb1_ref[...]
    h = jnp.maximum(h, 0.0)                     # ReLU
    hb = h.astype(bf16)

    # Split encoder head: mu and logvar each land in their own lane-dense
    # (TB, LP) slab (true values in cols [0, L), zeros elsewhere).
    mu = jnp.dot(hb, ew2m_ref[...], preferred_element_type=f32) + eb2m_ref[...]
    lv = jnp.dot(hb, ew2v_ref[...], preferred_element_type=f32) + eb2v_ref[...]
    logvar = jnp.clip(lv, -15.0, 15.0)          # torch.clamp(logvar, -15, 15)
    mu_ref[...] = mu
    logvar_ref[...] = logvar

    # ---------------- reparameterize (whole-vreg f32 VPU/EUP math) ----------
    # Padded cols: logvar == 0 -> std == 1, eps == 0 -> z == mu == 0, so z is
    # already the zero-padded, lane-dense decoder input.
    std = jnp.exp(0.5 * logvar)
    z = mu + eps_ref[...] * std

    # ---------------- decoder (bf16 matmuls, f32 accumulate) ----------------
    h = jnp.dot(z.astype(bf16), dw0_ref[...], preferred_element_type=f32) + db0_ref[...]
    h = jnp.maximum(h, 0.0)                     # ReLU
    h = jnp.dot(h.astype(bf16), dw1_ref[...], preferred_element_type=f32) + db1_ref[...]
    h = jnp.maximum(h, 0.0)                     # ReLU
    logits = jnp.dot(h.astype(bf16), dw2_ref[...], preferred_element_type=f32) + db2_ref[...]
    recon_ref[...] = jax.nn.sigmoid(logits).astype(recon_ref.dtype)   # nn.Sigmoid()


def vae_forward(x, eps, params, *, batch_tile=128, recon_dtype=jnp.bfloat16):
    """x: (B, input_dim) f32; eps: (B, latent_dim) f32 (the randn_like draw).

    Returns (reconstruction[recon_dtype], mu[f32], logvar[f32]), matching the
    PyTorch forward.  batch_tile=128 is a good default; use 256 on v6e when B
    is large (amortizes the 256-wide MXU RHS push), and keep >= 2 tiles per
    core on v7x so tile DMA overlaps compute.
    """
    (ew0, eb0, ew1, eb1, ew2, eb2, dw0, db0, dw1, db1, dw2, db2) = params
    B, D = x.shape
    L = eps.shape[1]
    H = ew0.shape[1]
    assert ew2.shape[1] == 2 * L

    bf16 = jnp.bfloat16
    TB = min(batch_tile, _round_up(B, 8))   # shrink tile for small batches
    BP = _round_up(B, TB)                   # padded batch
    DP = _round_up(D, 128)                  # lane-dense input width
    HP = _round_up(H, 128)                  # lane-dense hidden width
    LP = _round_up(L, 128)                  # lane-dense latent slab width

    # Weights: pad to lane-dense shapes, cast to bf16 (MXU-native, halves
    # weight HBM->VMEM traffic).  Biases stay f32.
    ew0_p = _pad2(ew0, DP, HP).astype(bf16); eb0_p = _pad2(eb0, 1, HP)
    ew1_p = _pad2(ew1, HP, HP).astype(bf16); eb1_p = _pad2(eb1, 1, HP)
    # Split encoder head into mu / logvar halves so the kernel never touches
    # narrow lane slices.
    ew2m_p = _pad2(ew2[:, :L], HP, LP).astype(bf16); eb2m_p = _pad2(eb2[:, :L], 1, LP)
    ew2v_p = _pad2(ew2[:, L:], HP, LP).astype(bf16); eb2v_p = _pad2(eb2[:, L:], 1, LP)
    dw0_p = _pad2(dw0, LP, HP).astype(bf16); db0_p = _pad2(db0, 1, HP)
    dw1_p = _pad2(dw1, HP, HP).astype(bf16); db1_p = _pad2(db1, 1, HP)
    dw2_p = _pad2(dw2, HP, DP).astype(bf16); db2_p = _pad2(db2, 1, DP)

    # x: skip the wrapper pad/cast HBM round-trip when already aligned (the
    # kernel casts to bf16 in VMEM).  eps: lane-dense f32 slab, eps in cols
    # [0, L), zeros elsewhere.
    x_p = x if (BP, DP) == (B, D) else _pad2(x, BP, DP).astype(bf16)
    eps_p = _pad2(eps, BP, LP)

    grid = (BP // TB,)

    def row_spec(width):
        # Batch-tiled arrays: one (TB, width) tile per grid step.
        return pl.BlockSpec((TB, width), lambda i: (i, 0))

    def full_spec(arr):
        # Whole array resident in VMEM; constant block index -> DMA'd once.
        # TODO(synk): switch to pipeline_mode=pl.Buffered(1) when weight sizes
        # approach the VMEM budget (drops the default second buffer).
        return pl.BlockSpec(arr.shape, lambda i: (0, 0))

    resident = (ew0_p, eb0_p, ew1_p, eb1_p, ew2m_p, eb2m_p, ew2v_p, eb2v_p,
                dw0_p, db0_p, dw1_p, db1_p, dw2_p, db2_p)

    # VMEM budget: resident weights (x2 default buffers) + double-buffered
    # streamed tiles.  Hard precondition for the fully-fused path.
    weight_bytes = sum(int(a.size) * a.dtype.itemsize for a in resident)
    stream_tile_bytes = (TB * DP * x_p.dtype.itemsize                   # x tile
                         + TB * LP * 4                                   # eps tile
                         + TB * DP * jnp.dtype(recon_dtype).itemsize     # recon tile
                         + 2 * TB * LP * 4)                              # mu + logvar
    vmem_est = 2 * (weight_bytes + stream_tile_bytes) + (1 << 20)
    assert vmem_est <= 40 * 2**20, (
        f"~{vmem_est / 2**20:.1f} MiB VMEM needed; weights must be streamed "
        "(TODO(synk): K/N-tiled first/last layers) for this problem size.")
    vmem_limit = int(min(max(2 * vmem_est, 16 * 2**20), 48 * 2**20))

    flops = 2 * BP * (DP * HP + HP * HP + 2 * HP * LP + LP * HP + HP * HP + HP * DP)
    out_bytes = BP * DP * jnp.dtype(recon_dtype).itemsize + 2 * BP * LP * 4
    in_bytes = (int(x_p.size) * x_p.dtype.itemsize
                + int(eps_p.size) * 4 + weight_bytes)
    cost = pl.CostEstimate(flops=flops,
                           transcendentals=BP * (LP + DP),
                           bytes_accessed=in_bytes + out_bytes)

    recon_p, mu_p, lv_p = pl.pallas_call(
        vae_kernel,
        out_shape=(
            jax.ShapeDtypeStruct((BP, DP), recon_dtype),   # reconstruction
            jax.ShapeDtypeStruct((BP, LP), jnp.float32),   # mu slab
            jax.ShapeDtypeStruct((BP, LP), jnp.float32),   # logvar slab
        ),
        grid=grid,
        in_specs=[row_spec(DP), row_spec(LP)] + [full_spec(a) for a in resident],
        out_specs=(row_spec(DP), row_spec(LP), row_spec(LP)),
        compiler_params=pltpu.CompilerParams(
            dimension_semantics=("parallel",),   # shard batch tiles across TCs
            vmem_limit_bytes=vmem_limit),
        cost_estimate=cost,
    )(x_p, eps_p, *resident)

    recon = recon_p if (BP, DP) == (B, D) else recon_p[:B, :D]
    return recon, mu_p[:B, :L], lv_p[:B, :L]


def init_params(key, input_dim, hidden_dim, latent_dim):
    """Deterministic synthetic parameters. Weights stored as (in, out)."""
    dims = [
        # encoder
        (input_dim, hidden_dim),
        (hidden_dim, hidden_dim),
        (hidden_dim, latent_dim * 2),
        # decoder
        (latent_dim, hidden_dim),
        (hidden_dim, hidden_dim),
        (hidden_dim, input_dim),
    ]
    params = []
    for (fan_in, fan_out) in dims:
        key, kw, kb = jax.random.split(key, 3)
        scale = 1.0 / jnp.sqrt(jnp.float32(fan_in))
        w = jax.random.uniform(kw, (fan_in, fan_out), jnp.float32, -scale, scale)
        b = jax.random.uniform(kb, (1, fan_out), jnp.float32, -scale, scale)
        params.append(w)
        params.append(b)
    return params


def vae_reference(x, eps, params):
    """Pure-JAX reference mirroring the kernel numerics (bf16 matmul, f32 acc)."""
    (ew0, eb0, ew1, eb1, ew2, eb2, dw0, db0, dw1, db1, dw2, db2) = params
    latent_dim = eps.shape[1]

    def mm(a, w):
        return jnp.dot(a.astype(jnp.bfloat16), w.astype(jnp.bfloat16),
                       preferred_element_type=jnp.float32)

    h = jnp.maximum(mm(x, ew0) + eb0, 0.0)
    h = jnp.maximum(mm(h, ew1) + eb1, 0.0)
    z2 = mm(h, ew2) + eb2
    mu = z2[:, :latent_dim]
    logvar = jnp.clip(z2[:, latent_dim:], -15.0, 15.0)
    z = mu + eps * jnp.exp(0.5 * logvar)
    h = jnp.maximum(mm(z, dw0) + db0, 0.0)
    h = jnp.maximum(mm(h, dw1) + db1, 0.0)
    recon = jax.nn.sigmoid(mm(h, dw2) + db2)
    return recon, mu, logvar


if __name__ == "__main__":
    # Small shapes consistent with the module (size=16 -> input_dim=256,
    # hidden_dim=32, latent_dim=2), with a real batch (256 rows = 2 grid tiles
    # of 128) so the MXU/grid path is actually exercised.
    B = 256
    size = 16
    input_dim = size * size
    hidden_dim = 32           # wrapper pads the hidden width to 128 lanes
    latent_dim = 2

    key = jax.random.PRNGKey(0)
    key, kx, keps, kp = jax.random.split(key, 4)

    x = jax.random.uniform(kx, (B, input_dim), jnp.float32)       # flattened images
    eps = jax.random.normal(keps, (B, latent_dim), jnp.float32)   # torch.randn_like(std)
    params = init_params(kp, input_dim, hidden_dim, latent_dim)

    recon, mu, logvar = vae_forward(x, eps, params)
    jax.block_until_ready((recon, mu, logvar))

    # Sanity check against pure-JAX reference with matching bf16-matmul numerics.
    r_ref, mu_ref, lv_ref = vae_reference(x, eps, params)
    assert recon.shape == (B, input_dim) and recon.dtype == jnp.bfloat16
    assert mu.shape == (B, latent_dim) and logvar.shape == (B, latent_dim)
    assert jnp.allclose(recon.astype(jnp.float32), r_ref, atol=1e-2, rtol=1e-2)
    assert jnp.allclose(mu, mu_ref, atol=2e-3, rtol=2e-3)
    assert jnp.allclose(logvar, lv_ref, atol=2e-3, rtol=2e-3)

    print("KERNEL_OK")
</pallas_src>

<mosaic_0001>
module attributes {stable_mosaic.version = 11 : i64} {
  func.func @vae_kernel(%arg0: i32, %arg1: memref<128x256xf32, #tpu.memory_space<vmem>>, %arg2: memref<128x128xf32, #tpu.memory_space<vmem>>, %arg3: memref<256x128xbf16, #tpu.memory_space<vmem>>, %arg4: memref<1x128xf32, #tpu.memory_space<vmem>>, %arg5: memref<128x128xbf16, #tpu.memory_space<vmem>>, %arg6: memref<1x128xf32, #tpu.memory_space<vmem>>, %arg7: memref<128x128xbf16, #tpu.memory_space<vmem>>, %arg8: memref<1x128xf32, #tpu.memory_space<vmem>>, %arg9: memref<128x128xbf16, #tpu.memory_space<vmem>>, %arg10: memref<1x128xf32, #tpu.memory_space<vmem>>, %arg11: memref<128x128xbf16, #tpu.memory_space<vmem>>, %arg12: memref<1x128xf32, #tpu.memory_space<vmem>>, %arg13: memref<128x128xbf16, #tpu.memory_space<vmem>>, %arg14: memref<1x128xf32, #tpu.memory_space<vmem>>, %arg15: memref<128x256xbf16, #tpu.memory_space<vmem>>, %arg16: memref<1x256xf32, #tpu.memory_space<vmem>>, %arg17: memref<128x256xbf16, #tpu.memory_space<vmem>>, %arg18: memref<128x128xf32, #tpu.memory_space<vmem>>, %arg19: memref<128x128xf32, #tpu.memory_space<vmem>>) attributes {dimension_semantics = [#tpu.dimension_semantics<parallel>], iteration_bounds = array<i64: 2>, scalar_prefetch = 0 : i64, scratch_operands = 0 : i64, tpu.core_type = #tpu.core_type<tc>, window_params = [{transform_indices = @transform_0, window_bounds = array<i64: 128, 256>}, {transform_indices = @transform_1, window_bounds = array<i64: 128, 128>}, {pipeline_mode = #tpu.pipeline_mode<synchronous>, transform_indices = @transform_2, window_bounds = array<i64: 256, 128>}, {pipeline_mode = #tpu.pipeline_mode<synchronous>, transform_indices = @transform_3, window_bounds = array<i64: 1, 128>}, {pipeline_mode = #tpu.pipeline_mode<synchronous>, transform_indices = @transform_4, window_bounds = array<i64: 128, 128>}, {pipeline_mode = #tpu.pipeline_mode<synchronous>, transform_indices = @transform_5, window_bounds = array<i64: 1, 128>}, {pipeline_mode = #tpu.pipeline_mode<synchronous>, transform_indices = @transform_6, window_bounds = array<i64: 128, 128>}, {pipeline_mode = #tpu.pipeline_mode<synchronous>, transform_indices = @transform_7, window_bounds = array<i64: 1, 128>}, {pipeline_mode = #tpu.pipeline_mode<synchronous>, transform_indices = @transform_8, window_bounds = array<i64: 128, 128>}, {pipeline_mode = #tpu.pipeline_mode<synchronous>, transform_indices = @transform_9, window_bounds = array<i64: 1, 128>}, {pipeline_mode = #tpu.pipeline_mode<synchronous>, transform_indices = @transform_10, window_bounds = array<i64: 128, 128>}, {pipeline_mode = #tpu.pipeline_mode<synchronous>, transform_indices = @transform_11, window_bounds = array<i64: 1, 128>}, {pipeline_mode = #tpu.pipeline_mode<synchronous>, transform_indices = @transform_12, window_bounds = array<i64: 128, 128>}, {pipeline_mode = #tpu.pipeline_mode<synchronous>, transform_indices = @transform_13, window_bounds = array<i64: 1, 128>}, {pipeline_mode = #tpu.pipeline_mode<synchronous>, transform_indices = @transform_14, window_bounds = array<i64: 128, 256>}, {pipeline_mode = #tpu.pipeline_mode<synchronous>, transform_indices = @transform_15, window_bounds = array<i64: 1, 256>}, {transform_indices = @transform_16, window_bounds = array<i64: 128, 256>}, {transform_indices = @transform_17, window_bounds = array<i64: 128, 128>}, {transform_indices = @transform_18, window_bounds = array<i64: 128, 128>}]} {
    %c0 = arith.constant 0 : index
    %c0_0 = arith.constant 0 : index
    %0 = vector.load %arg1[%c0, %c0_0] : memref<128x256xf32, #tpu.memory_space<vmem>>, vector<128x256xf32>
    %1 = arith.truncf %0 : vector<128x256xf32> to vector<128x256xbf16>
    %c0_1 = arith.constant 0 : index
    %c0_2 = arith.constant 0 : index
    %2 = vector.load %arg3[%c0_1, %c0_2] : memref<256x128xbf16, #tpu.memory_space<vmem>>, vector<256x128xbf16>
    %cst = arith.constant dense<0.000000e+00> : vector<128x128xf32>
    %3 = tpu.matmul %1, %2, %cst {dimension_numbers = #tpu.dot_dimension_numbers<[1], [0], [0], [1], [0, 0, 1, 1], [], []>} : vector<128x256xbf16>, vector<256x128xbf16>, vector<128x128xf32> -> vector<128x128xf32>
    %c0_3 = arith.constant 0 : index
    %c0_4 = arith.constant 0 : index
    %4 = vector.load %arg4[%c0_3, %c0_4] : memref<1x128xf32, #tpu.memory_space<vmem>>, vector<1x128xf32>
    %5 = vector.broadcast %4 : vector<1x128xf32> to vector<128x128xf32>
    %6 = arith.addf %3, %5 : vector<128x128xf32>
    %cst_5 = arith.constant 0.000000e+00 : f32
    %7 = vector.broadcast %cst_5 : f32 to vector<128x128xf32>
    %8 = arith.maximumf %6, %7 : vector<128x128xf32>
    %9 = arith.truncf %8 : vector<128x128xf32> to vector<128x128xbf16>
    %c0_6 = arith.constant 0 : index
    %c0_7 = arith.constant 0 : index
    %10 = vector.load %arg5[%c0_6, %c0_7] : memref<128x128xbf16, #tpu.memory_space<vmem>>, vector<128x128xbf16>
    %cst_8 = arith.constant dense<0.000000e+00> : vector<128x128xf32>
    %11 = tpu.matmul %9, %10, %cst_8 {dimension_numbers = #tpu.dot_dimension_numbers<[1], [0], [0], [1], [0, 0, 1, 1], [], []>} : vector<128x128xbf16>, vector<128x128xbf16>, vector<128x128xf32> -> vector<128x128xf32>
    %c0_9 = arith.constant 0 : index
    %c0_10 = arith.constant 0 : index
    %12 = vector.load %arg6[%c0_9, %c0_10] : memref<1x128xf32, #tpu.memory_space<vmem>>, vector<1x128xf32>
    %13 = vector.broadcast %12 : vector<1x128xf32> to vector<128x128xf32>
    %14 = arith.addf %11, %13 : vector<128x128xf32>
    %cst_11 = arith.constant 0.000000e+00 : f32
    %15 = vector.broadcast %cst_11 : f32 to vector<128x128xf32>
    %16 = arith.maximumf %14, %15 : vector<128x128xf32>
    %17 = arith.truncf %16 : vector<128x128xf32> to vector<128x128xbf16>
    %c0_12 = arith.constant 0 : index
    %c0_13 = arith.constant 0 : index
    %18 = vector.load %arg7[%c0_12, %c0_13] : memref<128x128xbf16, #tpu.memory_space<vmem>>, vector<128x128xbf16>
    %cst_14 = arith.constant dense<0.000000e+00> : vector<128x128xf32>
    %19 = tpu.matmul %17, %18, %cst_14 {dimension_numbers = #tpu.dot_dimension_numbers<[1], [0], [0], [1], [0, 0, 1, 1], [], []>} : vector<128x128xbf16>, vector<128x128xbf16>, vector<128x128xf32> -> vector<128x128xf32>
    %c0_15 = arith.constant 0 : index
    %c0_16 = arith.constant 0 : index
    %20 = vector.load %arg8[%c0_15, %c0_16] : memref<1x128xf32, #tpu.memory_space<vmem>>, vector<1x128xf32>
    %21 = vector.broadcast %20 : vector<1x128xf32> to vector<128x128xf32>
    %22 = arith.addf %19, %21 : vector<128x128xf32>
    %c0_17 = arith.constant 0 : index
    %c0_18 = arith.constant 0 : index
    %23 = vector.load %arg9[%c0_17, %c0_18] : memref<128x128xbf16, #tpu.memory_space<vmem>>, vector<128x128xbf16>
    %cst_19 = arith.constant dense<0.000000e+00> : vector<128x128xf32>
    %24 = tpu.matmul %17, %23, %cst_19 {dimension_numbers = #tpu.dot_dimension_numbers<[1], [0], [0], [1], [0, 0, 1, 1], [], []>} : vector<128x128xbf16>, vector<128x128xbf16>, vector<128x128xf32> -> vector<128x128xf32>
    %c0_20 = arith.constant 0 : index
    %c0_21 = arith.constant 0 : index
    %25 = vector.load %arg10[%c0_20, %c0_21] : memref<1x128xf32, #tpu.memory_space<vmem>>, vector<1x128xf32>
    %26 = vector.broadcast %25 : vector<1x128xf32> to vector<128x128xf32>
    %27 = arith.addf %24, %26 : vector<128x128xf32>
    %cst_22 = arith.constant -1.500000e+01 : f32
    %cst_23 = arith.constant 1.500000e+01 : f32
    %28 = vector.broadcast %cst_22 : f32 to vector<128x128xf32>
    %29 = arith.maximumf %28, %27 : vector<128x128xf32>
    %30 = vector.broadcast %cst_23 : f32 to vector<128x128xf32>
    %31 = arith.minimumf %30, %29 : vector<128x128xf32>
    %c0_24 = arith.constant 0 : index
    %c0_25 = arith.constant 0 : index
    %32 = vector.load %arg18[%c0_24, %c0_25] : memref<128x128xf32, #tpu.memory_space<vmem>>, vector<128x128xf32>
    tpu.vector_store %arg18[%c0_24, %c0_25], %22 {strides = array<i32>} : memref<128x128xf32, #tpu.memory_space<vmem>>, vector<128x128xf32>,
    %c0_26 = arith.constant 0 : index
    %c0_27 = arith.constant 0 : index
    %33 = vector.load %arg19[%c0_26, %c0_27] : memref<128x128xf32, #tpu.memory_space<vmem>>, vector<128x128xf32>
    tpu.vector_store %arg19[%c0_26, %c0_27], %31 {strides = array<i32>} : memref<128x128xf32, #tpu.memory_space<vmem>>, vector<128x128xf32>,
    %cst_28 = arith.constant 5.000000e-01 : f32
    %34 = vector.broadcast %cst_28 : f32 to vector<128x128xf32>
    %35 = arith.mulf %34, %31 : vector<128x128xf32>
    %36 = math.exp %35 : vector<128x128xf32>
    %c0_29 = arith.constant 0 : index
    %c0_30 = arith.constant 0 : index
    %37 = vector.load %arg2[%c0_29, %c0_30] : memref<128x128xf32, #tpu.memory_space<vmem>>, vector<128x128xf32>
    %38 = arith.mulf %37, %36 : vector<128x128xf32>
    %39 = arith.addf %22, %38 : vector<128x128xf32>
    %40 = arith.truncf %39 : vector<128x128xf32> to vector<128x128xbf16>
    %c0_31 = arith.constant 0 : index
    %c0_32 = arith.constant 0 : index
    %41 = vector.load %arg11[%c0_31, %c0_32] : memref<128x128xbf16, #tpu.memory_space<vmem>>, vector<128x128xbf16>
    %cst_33 = arith.constant dense<0.000000e+00> : vector<128x128xf32>
    %42 = tpu.matmul %40, %41, %cst_33 {dimension_numbers = #tpu.dot_dimension_numbers<[1], [0], [0], [1], [0, 0, 1, 1], [], []>} : vector<128x128xbf16>, vector<128x128xbf16>, vector<128x128xf32> -> vector<128x128xf32>
    %c0_34 = arith.constant 0 : index
    %c0_35 = arith.constant 0 : index
    %43 = vector.load %arg12[%c0_34, %c0_35] : memref<1x128xf32, #tpu.memory_space<vmem>>, vector<1x128xf32>
    %44 = vector.broadcast %43 : vector<1x128xf32> to vector<128x128xf32>
    %45 = arith.addf %42, %44 : vector<128x128xf32>
    %cst_36 = arith.constant 0.000000e+00 : f32
    %46 = vector.broadcast %cst_36 : f32 to vector<128x128xf32>
    %47 = arith.maximumf %45, %46 : vector<128x128xf32>
    %48 = arith.truncf %47 : vector<128x128xf32> to vector<128x128xbf16>
    %c0_37 = arith.constant 0 : index
    %c0_38 = arith.constant 0 : index
    %49 = vector.load %arg13[%c0_37, %c0_38] : memref<128x128xbf16, #tpu.memory_space<vmem>>, vector<128x128xbf16>
    %cst_39 = arith.constant dense<0.000000e+00> : vector<128x128xf32>
    %50 = tpu.matmul %48, %49, %cst_39 {dimension_numbers = #tpu.dot_dimension_numbers<[1], [0], [0], [1], [0, 0, 1, 1], [], []>} : vector<128x128xbf16>, vector<128x128xbf16>, vector<128x128xf32> -> vector<128x128xf32>
    %c0_40 = arith.constant 0 : index
    %c0_41 = arith.constant 0 : index
    %51 = vector.load %arg14[%c0_40, %c0_41] : memref<1x128xf32, #tpu.memory_space<vmem>>, vector<1x128xf32>
    %52 = vector.broadcast %51 : vector<1x128xf32> to vector<128x128xf32>
    %53 = arith.addf %50, %52 : vector<128x128xf32>
    %cst_42 = arith.constant 0.000000e+00 : f32
    %54 = vector.broadcast %cst_42 : f32 to vector<128x128xf32>
    %55 = arith.maximumf %53, %54 : vector<128x128xf32>
    %56 = arith.truncf %55 : vector<128x128xf32> to vector<128x128xbf16>
    %c0_43 = arith.constant 0 : index
    %c0_44 = arith.constant 0 : index
    %57 = vector.load %arg15[%c0_43, %c0_44] : memref<128x256xbf16, #tpu.memory_space<vmem>>, vector<128x256xbf16>
    %cst_45 = arith.constant dense<0.000000e+00> : vector<128x256xf32>
    %58 = tpu.matmul %56, %57, %cst_45 {dimension_numbers = #tpu.dot_dimension_numbers<[1], [0], [0], [1], [0, 0, 1, 1], [], []>} : vector<128x128xbf16>, vector<128x256xbf16>, vector<128x256xf32> -> vector<128x256xf32>
    %c0_46 = arith.constant 0 : index
    %c0_47 = arith.constant 0 : index
    %59 = vector.load %arg16[%c0_46, %c0_47] : memref<1x256xf32, #tpu.memory_space<vmem>>, vector<1x256xf32>
    %60 = vector.broadcast %59 : vector<1x256xf32> to vector<128x256xf32>
    %61 = arith.addf %58, %60 : vector<128x256xf32>
    %62 = arith.negf %61 : vector<128x256xf32>
    %63 = math.exp %62 : vector<128x256xf32>
    %cst_48 = arith.constant 1.000000e+00 : f32
    %64 = vector.broadcast %cst_48 : f32 to vector<128x256xf32>
    %65 = arith.addf %64, %63 : vector<128x256xf32>
    %66 = arith.divf %64, %65 : vector<128x256xf32>
    %67 = arith.truncf %66 : vector<128x256xf32> to vector<128x256xbf16>
    %c0_49 = arith.constant 0 : index
    %c0_50 = arith.constant 0 : index
    %68 = vector.load %arg17[%c0_49, %c0_50] : memref<128x256xbf16, #tpu.memory_space<vmem>>, vector<128x256xbf16>
    tpu.vector_store %arg17[%c0_49, %c0_50], %67 {strides = array<i32>} : memref<128x256xbf16, #tpu.memory_space<vmem>>, vector<128x256xbf16>,
    return
  }
  func.func @transform_0(%arg0: i32) -> (i32, i32) {
    %c0_i32 = arith.constant 0 : i32
    %c0_i32_0 = arith.constant 0 : i32
    return %arg0, %c0_i32 : i32, i32
  }
  func.func @transform_1(%arg0: i32) -> (i32, i32) {
    %c0_i32 = arith.constant 0 : i32
    %c0_i32_0 = arith.constant 0 : i32
    return %arg0, %c0_i32 : i32, i32
  }
  func.func @transform_2(%arg0: i32) -> (i32, i32) {
    %c0_i32 = arith.constant 0 : i32
    %c0_i32_0 = arith.constant 0 : i32
    %c0_i32_1 = arith.constant 0 : i32
    return %c0_i32, %c0_i32_0 : i32, i32
  }
  func.func @transform_3(%arg0: i32) -> (i32, i32) {
    %c0_i32 = arith.constant 0 : i32
    %c0_i32_0 = arith.constant 0 : i32
    %c0_i32_1 = arith.constant 0 : i32
    return %c0_i32, %c0_i32_0 : i32, i32
  }
  func.func @transform_4(%arg0: i32) -> (i32, i32) {
    %c0_i32 = arith.constant 0 : i32
    %c0_i32_0 = arith.constant 0 : i32
    %c0_i32_1 = arith.constant 0 : i32
    return %c0_i32, %c0_i32_0 : i32, i32
  }
  func.func @transform_5(%arg0: i32) -> (i32, i32) {
    %c0_i32 = arith.constant 0 : i32
    %c0_i32_0 = arith.constant 0 : i32
    %c0_i32_1 = arith.constant 0 : i32
    return %c0_i32, %c0_i32_0 : i32, i32
  }
  func.func @transform_6(%arg0: i32) -> (i32, i32) {
    %c0_i32 = arith.constant 0 : i32
    %c0_i32_0 = arith.constant 0 : i32
    %c0_i32_1 = arith.constant 0 : i32
    return %c0_i32, %c0_i32_0 : i32, i32
  }
  func.func @transform_7(%arg0: i32) -> (i32, i32) {
    %c0_i32 = arith.constant 0 : i32
    %c0_i32_0 = arith.constant 0 : i32
    %c0_i32_1 = arith.constant 0 : i32
    return %c0_i32, %c0_i32_0 : i32, i32
  }
  func.func @transform_8(%arg0: i32) -> (i32, i32) {
    %c0_i32 = arith.constant 0 : i32
    %c0_i32_0 = arith.constant 0 : i32
    %c0_i32_1 = arith.constant 0 : i32
    return %c0_i32, %c0_i32_0 : i32, i32
  }
  func.func @transform_9(%arg0: i32) -> (i32, i32) {
    %c0_i32 = arith.constant 0 : i32
    %c0_i32_0 = arith.constant 0 : i32
    %c0_i32_1 = arith.constant 0 : i32
    return %c0_i32, %c0_i32_0 : i32, i32
  }
  func.func @transform_10(%arg0: i32) -> (i32, i32) {
    %c0_i32 = arith.constant 0 : i32
    %c0_i32_0 = arith.constant 0 : i32
    %c0_i32_1 = arith.constant 0 : i32
    return %c0_i32, %c0_i32_0 : i32, i32
  }
  func.func @transform_11(%arg0: i32) -> (i32, i32) {
    %c0_i32 = arith.constant 0 : i32
    %c0_i32_0 = arith.constant 0 : i32
    %c0_i32_1 = arith.constant 0 : i32
    return %c0_i32, %c0_i32_0 : i32, i32
  }
  func.func @transform_12(%arg0: i32) -> (i32, i32) {
    %c0_i32 = arith.constant 0 : i32
    %c0_i32_0 = arith.constant 0 : i32
    %c0_i32_1 = arith.constant 0 : i32
    return %c0_i32, %c0_i32_0 : i32, i32
  }
  func.func @transform_13(%arg0: i32) -> (i32, i32) {
    %c0_i32 = arith.constant 0 : i32
    %c0_i32_0 = arith.constant 0 : i32
    %c0_i32_1 = arith.constant 0 : i32
    return %c0_i32, %c0_i32_0 : i32, i32
  }
  func.func @transform_14(%arg0: i32) -> (i32, i32) {
    %c0_i32 = arith.constant 0 : i32
    %c0_i32_0 = arith.constant 0 : i32
    %c0_i32_1 = arith.constant 0 : i32
    return %c0_i32, %c0_i32_0 : i32, i32
  }
  func.func @transform_15(%arg0: i32) -> (i32, i32) {
    %c0_i32 = arith.constant 0 : i32
    %c0_i32_0 = arith.constant 0 : i32
    %c0_i32_1 = arith.constant 0 : i32
    return %c0_i32, %c0_i32_0 : i32, i32
  }
  func.func @transform_16(%arg0: i32) -> (i32, i32) {
    %c0_i32 = arith.constant 0 : i32
    %c0_i32_0 = arith.constant 0 : i32
    return %arg0, %c0_i32 : i32, i32
  }
  func.func @transform_17(%arg0: i32) -> (i32, i32) {
    %c0_i32 = arith.constant 0 : i32
    %c0_i32_0 = arith.constant 0 : i32
    return %arg0, %c0_i32 : i32, i32
  }
  func.func @transform_18(%arg0: i32) -> (i32, i32) {
    %c0_i32 = arith.constant 0 : i32
    %c0_i32_0 = arith.constant 0 : i32
    return %arg0, %c0_i32 : i32, i32
  }
}

</mosaic_0001>

<bundles_post_ra>
// kernel: tpu_custom_call.1
= control target key start
LH: loop header
LB: loop body
LE: loop exit
PB: predicated region body
PF: predicated region fallthrough
CT: control target
= control target key end

     0   :  { %s5195_s0 = inlined_call_operand.hbm [shape: f32[256,256], index: 0, kind: input, shape index: {}]   ;;  %s5196_s1 = inlined_call_operand.hbm [shape: f32[256,128], index: 1, kind: input, shape index: {}]   ;;  %s5197_s2 = inlined_call_operand.hbm [shape: bf16[256,128], index: 2, kind: input, shape index: {}]   ;;  %s5198_s3 = inlined_call_operand.vmem [shape: f32[1,128], index: 3, kind: input, shape index: {}]   ;;  %s5199_s4 = inlined_call_operand.hbm [shape: bf16[128,128], index: 4, kind: input, shape index: {}]   ;;  %s5200_s5 = inlined_call_operand.vmem [shape: f32[1,128], index: 5, kind: input, shape index: {}]   ;;  %s5201_s6 = inlined_call_operand.hbm [shape: bf16[128,128], index: 6, kind: input, shape index: {}]   ;;  %s5202_s7 = inlined_call_operand.vmem [shape: f32[1,128], index: 7, kind: input, shape index: {}]   ;;  %s5203_s8 = inlined_call_operand.hbm [shape: bf16[128,128], index: 8, kind: input, shape index: {}]   ;;  %s5204_s9 = inlined_call_operand.vmem [shape: f32[1,128], index: 9, kind: input, shape index: {}]   ;;  %s5205_s10 = inlined_call_operand.hbm [shape: bf16[128,128], index: 10, kind: input, shape index: {}]   ;;  %s5206_s11 = inlined_call_operand.vmem [shape: f32[1,128], index: 11, kind: input, shape index: {}]   ;;  %s5207_s12 = inlined_call_operand.hbm [shape: bf16[128,128], index: 12, kind: input, shape index: {}]   ;;  %s5208_s13 = inlined_call_operand.vmem [shape: f32[1,128], index: 13, kind: input, shape index: {}]   ;;  %s5209_s14 = inlined_call_operand.hbm [shape: bf16[128,256], index: 14, kind: input, shape index: {}]   ;;  %s5210_s15 = inlined_call_operand.vmem [shape: f32[1,256], index: 15, kind: input, shape index: {}]   ;;  %s5211_s16 = inlined_call_operand.hbm [shape: bf16[256,256], index: 16, kind: output, shape index: {0}]   ;;  %s5212_s17 = inlined_call_operand.hbm [shape: f32[256,128], index: 17, kind: output, shape index: {1}]   ;;  %s5213_s18 = inlined_call_operand.hbm [shape: f32[256,128], index: 18, kind: output, shape index: {2}]  }
   0x1   :  { %5228 = sst [smem:[#allocation29_spill]] %s5195_s0 }
   0x2   :  { %5229 = sst [smem:[#allocation30_spill]] %s5196_s1 }
   0x3   :  { %5230 = sst [smem:[#allocation31_spill]] %s5197_s2 }
   0x4   :  { %5231 = sst [smem:[#allocation32_spill]] %s5199_s4 }
   0x5   :  { %5232 = sst [smem:[#allocation33_spill]] %s5201_s6 }
   0x6   :  { %5233 = sst [smem:[#allocation34_spill]] %s5202_s7 }
   0x7   :  { %5234 = sst [smem:[#allocation35_spill]] %s5203_s8 }
   0x8   :  { %5235 = sst [smem:[#allocation36_spill]] %s5204_s9 }
   0x9   :  { %5236 = sst [smem:[#allocation37_spill]] %s5205_s10 }
   0xa   :  { %5237 = sst [smem:[#allocation38_spill]] %s5206_s11 }
   0xb   :  { %5238 = sst [smem:[#allocation39_spill]] %s5207_s12 }
   0xc   :  { %5239 = sst [smem:[#allocation40_spill]] %s5208_s13 }
   0xd   :  { %5240 = sst [smem:[#allocation41_spill]] %s5209_s14 }
   0xe   :  { %5241 = sst [smem:[#allocation42_spill]] %s5210_s15 }
   0xf   :  { %5242 = sst [smem:[#allocation43_spill]] %s5211_s16 }
  0x10   :  { %5243 = sst [smem:[#allocation44_spill]] %s5212_s17 }
  0x11   :  { %5244 = sst [smem:[#allocation45_spill]] %s5213_s18 }
  0x12   :  { %24 = vsyncpa [#allocation3], 0 }
  0x13   :  { %26 = vsyncpa [#allocation3 + $0x1], 0 }
  0x14   :  { %27 = vsyncpa [#allocation6], 0 }
  0x15   :  { %29 = vsyncpa [#allocation6 + $0x1], 0 }
  0x16   :  { %30 = vsyncpa [#allocation9], 0 }
  0x17   :  { %31 = vsyncpa [#allocation12], 0 }
  0x18   :  { %32 = vsyncpa [#allocation15], 0 }
  0x19   :  { %33 = vsyncpa [#allocation4], 0 }
  0x1a   :  { %35 = vsyncpa [#allocation4 + $0x1], 0 }
  0x1b   :  { %36 = vsyncpa [#allocation19], 0 }
  0x1c   :  { %38 = vsyncpa [#allocation19 + $0x1], 0  ;;  %s4377_s27 = smov 0   ;;  %s4379_s28 = smov 0  }
  0x1d   :  { %s4381_s29 = smov 0   ;;  %s4383_s30 = smov 0  }
  0x1e LB: > { %s4261_s0 = smov [#allocation7]   ;;  %s4398_s1 = sadd.s32 4294967295, %s4259_s30   ;;  %s4259_s30 = sphi %s4383_s30, %s5289_s30   ;;  %s4255_s29 = sphi %s4381_s29, %s5288_s29   ;;  %s4251_s28 = sphi %s4379_s28, %s5287_s28   ;;  %s4247_s27 = sphi %s4377_s27, %s5286_s27  }
  0x1f   : > { %s485_s19 = sshll.u32 %s4261_s0, 4  ;;  %p2950_p0 = scmp.ge.s32.totalorder %s4259_s30, 1  ;;  %s4403_s19 = int_to_ptr.vmem [resolvable:$true] %s485_s19 }
  0x20   : > { %p5221_p1 = scmp.eq.s32.totalorder %s4398_s1, 0  ;;  %p473_p2 = scmp.lt.s32.totalorder %s4259_s30, 3 }
  0x21   : > { %s4262_s21 = smov [#allocation8]   ;;  %s4263_s23 = smov [#allocation11]  }
  0x22   : > { %p4405_p3 = pnand %p2950_p0, %p473_p2  ;;  %s501_s22 = sshll.u32 %s4262_s21, 4  ;;  %s4418_s22 = int_to_ptr.vmem [resolvable:$true] %s501_s22 }
  0x23   : > { %s533_s24 = sshll.u32 %s4263_s23, 4  ;;  %s5247_s0 = sld [smem:[#allocation31_spill]]  ;;  %s4420_s24 = int_to_ptr.vmem [resolvable:$true] %s533_s24 }
  0x24   : > { %s5245_s20 = scalar_select %p4405_p3, 1, 0 }
  0x25   : > { %p3514_p5 = pneg %p4405_p3 }
  0x27   : > { %p4414_p6 = pnand %p3514_p5, %p5221_p1 }
  0x29   : > { %s3857_s16 = scalar_lea.hbm %s5247_s0, 2048  ;;  %p4430_p8 = pneg %p4414_p6 }
  0x2a   : > { %p3858_p7 = scmp.ne.s32.totalorder %s5247_s0, %s3857_s16  ;;  %p3864_p11 = scmp.lt.u32.totalorder %s3857_s16, %s5247_s0 }
  0x2c   : > { %p3860_p9 = pnand %p4430_p8, %p3858_p7 }
  0x2e   : > { %p3861_p10 = pneg %p3860_p9 }
  0x30   : > { %p3866_p12 = pnand %p3864_p11, %p3861_p10 }
  0x32   : > { %3869 = shalt.err (!%p3866_p12)
}
  0x33   : > { %s3870_s15 = scalar_lea.vmem %s4403_s19, 2048  ;;  %p3878_p5 = scmp.lt.s32.totalorder %s4403_s19, %s4403_s19 }
  0x34   : > { %p3871_p13 = scmp.ne.s32.totalorder %s4403_s19, %s3870_s15  ;;  %p3879_p4 = scmp.lt.s32.totalorder %s3870_s15, %s3870_s15 }
  0x36   : > { %p3873_p0 = pnand %p3871_p13, %p4430_p8  ;;  %p3880_p7 = por %p3879_p4, %p3878_p5 }
  0x38   : > { %p3874_p2 = pneg %p3873_p0 }
  0x3a   : > { %p3881_p9 = pnand %p3880_p7, %p3874_p2 }
  0x3c   : > { %3884 = shalt.err (!%p3881_p9)
}
  0x3d   : > { %s4264_s18 = smov 64   ;;  %s4265_s16 = smov 4  }
  0x3e   : > { %3517 = dma.hbm_to_vmem [thread:$0]  (!%p4414_p6), %s5247_s0, 2048, %s4403_s19, [#allocation6], %s4264_s18, %s4264_s18, %s4265_s16  }
  0x3f   : > { %s5249_s4 = sld [smem:[#allocation32_spill]] }
  0x45   : > { %s3885_s15 = scalar_lea.hbm %s5249_s4, 1024 }
  0x46   : > { %p3886_p4 = scmp.ne.s32.totalorder %s5249_s4, %s3885_s15  ;;  %p3892_p12 = scmp.lt.u32.totalorder %s3885_s15, %s5249_s4 }
  0x48   : > { %p3888_p10 = pnand %p3886_p4, %p4430_p8 }
  0x4a   : > { %p3889_p11 = pneg %p3888_p10 }
  0x4c   : > { %p3894_p13 = pnand %p3892_p12, %p3889_p11 }
  0x4e   : > { %3897 = shalt.err (!%p3894_p13)
}
  0x4f   : > { %s3898_s19 = scalar_lea.vmem %s4418_s22, 1024  ;;  %p3906_p7 = scmp.lt.s32.totalorder %s4418_s22, %s4418_s22 }
  0x50   : > { %p3899_p0 = scmp.ne.s32.totalorder %s4418_s22, %s3898_s19  ;;  %p3907_p9 = scmp.lt.s32.totalorder %s3898_s19, %s3898_s19 }
  0x52   : > { %p3901_p2 = pnand %p3899_p0, %p4430_p8  ;;  %p3908_p4 = por %p3907_p9, %p3906_p7 }
  0x54   : > { %p3902_p5 = pneg %p3901_p2 }
  0x56   : > { %p3909_p10 = pnand %p3908_p4, %p3902_p5 }
  0x58   : > { %3912 = shalt.err (!%p3909_p10)
}
  0x59   : > { %3520 = dma.hbm_to_vmem [thread:$0]  (!%p4414_p6), %s5249_s4, 1024, %s4418_s22, [#allocation9], %s4264_s18, %s4264_s18, %s4265_s16  }
  0x5a   : > { %s5250_s8 = sld [smem:[#allocation35_spill]] }
  0x60   : > { %s3913_s17 = scalar_lea.hbm %s5250_s8, 1024 }
  0x61   : > { %p3914_p11 = scmp.ne.s32.totalorder %s5250_s8, %s3913_s17  ;;  %p3920_p0 = scmp.lt.u32.totalorder %s3913_s17, %s5250_s8 }
  0x63   : > { %p3916_p12 = pnand %p3914_p11, %p4430_p8 }
  0x65   : > { %p3917_p13 = pneg %p3916_p12 }
  0x67   : > { %p3922_p2 = pnand %p3920_p0, %p3917_p13 }
  0x69   : > { %3925 = shalt.err (!%p3922_p2)
}
  0x6a   : > { %s3926_s22 = scalar_lea.vmem %s4420_s24, 1024  ;;  %p3934_p4 = scmp.lt.s32.totalorder %s4420_s24, %s4420_s24 }
  0x6b   : > { %p3927_p5 = scmp.ne.s32.totalorder %s4420_s24, %s3926_s22  ;;  %p3935_p10 = scmp.lt.s32.totalorder %s3926_s22, %s3926_s22 }
  0x6d   : > { %p3929_p7 = pnand %p3927_p5, %p4430_p8  ;;  %p3936_p11 = por %p3935_p10, %p3934_p4 }
  0x6f   : > { %p3930_p9 = pneg %p3929_p7 }
  0x71   : > { %p3937_p12 = pnand %p3936_p11, %p3930_p9 }
  0x73   : > { %3940 = shalt.err (!%p3937_p12)
}
  0x74   : > { %3526 = dma.hbm_to_vmem [thread:$0]  (!%p4414_p6), %s5250_s8, 1024, %s4420_s24, [#allocation12], %s4264_s18, %s4264_s18, %s4265_s16  }
  0x75   : > { %s4266_s9 = smov [#allocation14]   ;;  %s4267_s13 = smov [#allocation10]  }
  0x76   : > { %s565_s11 = sshll.u32 %s4266_s9, 4  ;;  %s517_s17 = sshll.u32 %s4267_s13, 4  ;;  %s566_s11 = int_to_ptr.vmem [resolvable:$true] %s565_s11  ;;  %s518_s17 = int_to_ptr.vmem [resolvable:$true] %s517_s17 }
  0x77   : > { %s5251_s12 = sld [smem:[#allocation39_spill]] }
  0x7d   : > { %s3941_s23 = scalar_lea.hbm %s5251_s12, 1024 }
  0x7e   : > { %p3942_p13 = scmp.ne.s32.totalorder %s5251_s12, %s3941_s23  ;;  %p3948_p5 = scmp.lt.u32.totalorder %s3941_s23, %s5251_s12 }
  0x80   : > { %p3944_p0 = pnand %p3942_p13, %p4430_p8 }
  0x82   : > { %p3945_p2 = pneg %p3944_p0 }
  0x84   : > { %p3950_p7 = pnand %p3948_p5, %p3945_p2 }
  0x86   : > { %3953 = shalt.err (!%p3950_p7)
}
  0x87   : > { %s3954_s24 = scalar_lea.vmem %s566_s11, 1024  ;;  %p3962_p11 = scmp.lt.s32.totalorder %s566_s11, %s566_s11 }
  0x88   : > { %p3955_p9 = scmp.ne.s32.totalorder %s566_s11, %s3954_s24  ;;  %p3963_p12 = scmp.lt.s32.totalorder %s3954_s24, %s3954_s24 }
  0x8a   : > { %p3957_p4 = pnand %p3955_p9, %p4430_p8  ;;  %p3964_p1 = por %p3963_p12, %p3962_p11 }
  0x8c   : > { %p3958_p10 = pneg %p3957_p4 }
  0x8e   : > { %p3965_p3 = pnand %p3964_p1, %p3958_p10 }
  0x90   : > { %3968 = shalt.err (!%p3965_p3)
}
  0x91   : > { %3532 = dma.hbm_to_vmem [thread:$0]  (!%p4414_p6), %s5251_s12, 1024, %s566_s11, [#allocation15], %s4264_s18, %s4264_s18, %s4265_s16  }
  0x92   : > { %s5252_s6 = sld [smem:[#allocation33_spill]] }
  0x98   : > { %s3969_s25 = scalar_lea.hbm %s5252_s6, 1024 }
  0x99   : > { %p3970_p1 = scmp.ne.s32.totalorder %s5252_s6, %s3969_s25  ;;  %p3976_p0 = scmp.lt.u32.totalorder %s3969_s25, %s5252_s6 }
  0x9b   : > { %p3972_p3 = pnand %p3970_p1, %p4430_p8 }
  0x9d   : > { %p3973_p13 = pneg %p3972_p3 }
  0x9f   : > { %p3978_p2 = pnand %p3976_p0, %p3973_p13 }
  0xa1   : > { %3981 = shalt.err (!%p3978_p2)
}
  0xa2   : > { %s3982_s19 = scalar_lea.vmem %s518_s17, 1024  ;;  %p3990_p4 = scmp.lt.s32.totalorder %s518_s17, %s518_s17 }
  0xa3   : > { %p3983_p5 = scmp.ne.s32.totalorder %s518_s17, %s3982_s19  ;;  %p3991_p10 = scmp.lt.s32.totalorder %s3982_s19, %s3982_s19 }
  0xa5   : > { %p3985_p7 = pnand %p3983_p5, %p4430_p8  ;;  %p3992_p11 = por %p3991_p10, %p3990_p4 }
  0xa7   : > { %p3986_p9 = pneg %p3985_p7 }
  0xa9   : > { %p3993_p12 = pnand %p3992_p11, %p3986_p9 }
  0xab   : > { %3996 = shalt.err (!%p3993_p12)
}
  0xac   : > { %3523 = dma.hbm_to_vmem [thread:$0]  (!%p4414_p6), %s5252_s6, 1024, %s518_s17, [#allocation9], %s4264_s18, %s4264_s18, %s4265_s16  }
  0xad   : > { %s4268_s0 = smov [#allocation13]   ;;  %s4269_s9 = smov [#allocation16]  }
  0xae   : > { %s549_s7 = sshll.u32 %s4268_s0, 4  ;;  %s581_s13 = sshll.u32 %s4269_s9, 4  ;;  %s550_s7 = int_to_ptr.vmem [resolvable:$true] %s549_s7  ;;  %s582_s13 = int_to_ptr.vmem [resolvable:$true] %s581_s13 }
  0xaf   : > { %s5253_s10 = sld [smem:[#allocation37_spill]] }
  0xb5   : > { %s3997_s23 = scalar_lea.hbm %s5253_s10, 1024 }
  0xb6   : > { %p3998_p1 = scmp.ne.s32.totalorder %s5253_s10, %s3997_s23  ;;  %p4004_p0 = scmp.lt.u32.totalorder %s3997_s23, %s5253_s10 }
  0xb8   : > { %p4000_p3 = pnand %p3998_p1, %p4430_p8 }
  0xba   : > { %p4001_p13 = pneg %p4000_p3 }
  0xbc   : > { %p4006_p2 = pnand %p4004_p0, %p4001_p13 }
  0xbe   : > { %4009 = shalt.err (!%p4006_p2)
}
  0xbf   : > { %s4010_s17 = scalar_lea.vmem %s550_s7, 1024  ;;  %p4018_p4 = scmp.lt.s32.totalorder %s550_s7, %s550_s7 }
  0xc0   : > { %p4011_p5 = scmp.ne.s32.totalorder %s550_s7, %s4010_s17  ;;  %p4019_p10 = scmp.lt.s32.totalorder %s4010_s17, %s4010_s17 }
  0xc2   : > { %p4013_p7 = pnand %p4011_p5, %p4430_p8  ;;  %p4020_p11 = por %p4019_p10, %p4018_p4 }
  0xc4   : > { %p4014_p9 = pneg %p4013_p7 }
  0xc6   : > { %p4021_p12 = pnand %p4020_p11, %p4014_p9 }
  0xc8   : > { %4024 = shalt.err (!%p4021_p12)
}
  0xc9   : > { %3529 = dma.hbm_to_vmem [thread:$0]  (!%p4414_p6), %s5253_s10, 1024, %s550_s7, [#allocation12], %s4264_s18, %s4264_s18, %s4265_s16  }
  0xca   : > { %s5254_s14 = sld [smem:[#allocation41_spill]] }
  0xd0   : > { %s4025_s26 = scalar_lea.hbm %s5254_s14, 2048 }
  0xd1   : > { %p4026_p1 = scmp.ne.s32.totalorder %s5254_s14, %s4025_s26  ;;  %p4032_p0 = scmp.lt.u32.totalorder %s4025_s26, %s5254_s14 }
  0xd3   : > { %p4028_p3 = pnand %p4026_p1, %p4430_p8 }
  0xd5   : > { %p4029_p13 = pneg %p4028_p3 }
  0xd7   : > { %p4034_p2 = pnand %p4032_p0, %p4029_p13 }
  0xd9   : > { %4037 = shalt.err (!%p4034_p2)
}
  0xda   : > { %s4038_s11 = scalar_lea.vmem %s582_s13, 2048  ;;  %p4046_p4 = scmp.lt.s32.totalorder %s582_s13, %s582_s13 }
  0xdb   : > { %p4039_p5 = scmp.ne.s32.totalorder %s582_s13, %s4038_s11  ;;  %p4047_p10 = scmp.lt.s32.totalorder %s4038_s11, %s4038_s11 }
  0xdd   : > { %p4041_p7 = pnand %p4039_p5, %p4430_p8  ;;  %p4048_p11 = por %p4047_p10, %p4046_p4 }
  0xdf   : > { %p4042_p9 = pneg %p4041_p7 }
  0xe1   : > { %p4049_p12 = pnand %p4048_p11, %p4042_p9 }
  0xe3   : > { %4052 = shalt.err (!%p4049_p12)
}
  0xe4   : > { %s5224_s18 = smov 128   ;;  %s5225_s21 = smov 8  }
  0xe5   : > { %3535 = dma.hbm_to_vmem [thread:$0]  (!%p4414_p6), %s5254_s14, 2048, %s582_s13, [#allocation15], %s5224_s18, %s5224_s18, %s5225_s21  }
  0xe6   : > { %s5223_s17 = sadd.s32 4294967294, %s4259_s30   ;;  %s4592_s24 = sadd.s32 1, %s4259_s30  }
  0xe7   : > { %s51_s0 = sadd.s32 1, %s4255_s29  ;;  %s48_s9 = ssub.s32 %s4259_s30, %s4592_s24 }
  0xe8   : > { %p58_p8 = scmp.ne.s32.totalorder %s4255_s29, %s4251_s28  ;;  %p49_p1 = scmp.eq.s32.totalorder %s48_s9, 0 }
  0xe9   : > { %p59_p3 = scmp.eq.s32.totalorder %s4259_s30, 0  ;;  %p64_p13 = scmp.ne.s32.totalorder %s4251_s28, %s4247_s27 }
  0xea   : > { %p408_p0 = scmp.eq.s32.totalorder %s4398_s1, 1  ;;  %p5255_p5 = scmp.eq.s32.totalorder %s4398_s1, 0 }
  0xeb   : > { %s4604_s2 = scalar_select %p49_p1, %s4255_s29, %s51_s0  }
  0xec   : > { %p60_p2 = por %p59_p3, %p58_p8  ;;  %p4608_p7 = por %p5255_p5, %p64_p13 }
  0xed   : > { %p4612_p6 = por %p408_p0, %p58_p8  ;;  %p414_p9 = scmp.eq.s32.totalorder %s5223_s17, 1 }
  0xee   : > { %p3560_p4 = scmp.lt.s32.totalorder %s4259_s30, 2  ;;  %s4620_s26 = sand.u32 1, %s4255_s29  }
  0xef   : > { %s5257_s13 = scalar_select %p4612_p6, 1, 0 }
  0xf0   : > { %p4622_p10 = por %p414_p9, %p64_p13  ;;  %s2959_s15 = sshll.u32 %s4620_s26, 8 }
  0xf1   : > { %s3134_s22 = sshll.u32 %s4259_s30, 12  ;;  %s5259_s16 = sld [smem:[#allocation29_spill]] }
  0xf2   : > { %s5258_s23 = scalar_select %p4622_p10, 1, 0 }
  0xf3   : > { %s602_s0 = scalar_lea.vmem [#allocation2], %s2959_s15  ;;  %p4633_p11 = pnand %p3560_p4, %p60_p2 }
  0xf4   : > { %s610_s9 = sshll.u32 %s602_s0, 4  ;;  %s4637_s9 = int_to_ptr.vmem [resolvable:$true] %s610_s9 }
  0xf5   : > { %p4055_p8 = pneg %p4633_p11 }
  0xf7   : > { %s4631_s7 = scalar_lea.hbm %s5259_s16, %s3134_s22  ;;  %s4058_s19 = scalar_lea.hbm %s5259_s16, 8192 }
  0xf8   : > { %s4053_s21 = scalar_lea.hbm %s4631_s7, 4096  ;;  %p4059_p13 = scmp.lt.u32.totalorder %s4631_s7, %s5259_s16 }
  0xf9   : > { %p4054_p12 = scmp.ne.s32.totalorder %s4631_s7, %s4053_s21  ;;  %p4060_p0 = scmp.lt.u32.totalorder %s4058_s19, %s4053_s21 }
  0xfa   : > { %p4062_p5 = scmp.lt.u32.totalorder %s4053_s21, %s4631_s7 }
  0xfb   : > { %p4056_p1 = pnand %p4055_p8, %p4054_p12  ;;  %p4061_p2 = por %p4060_p0, %p4059_p13 }
  0xfd   : > { %p4057_p3 = pneg %p4056_p1  ;;  %p4063_p9 = por %p4062_p5, %p4061_p2 }
  0xff   : > { %p4064_p4 = pnand %p4063_p9, %p4057_p3 }
 0x101   : > { %4067 = shalt.err (!%p4064_p4)
}
 0x102   : > { %s4068_s18 = scalar_lea.vmem %s4637_s9, 4096  ;;  %s4272_s22 = smov [#allocation2]  }
 0x103   : > { %p4069_p12 = scmp.ne.s32.totalorder %s4637_s9, %s4068_s18  ;;  %s4073_s15 = sshll.u32 %s4272_s22, 4  ;;  %s4074_s15 = int_to_ptr.vmem [resolvable:$false] %s4073_s15 }
 0x104   : > { %s4075_s11 = scalar_lea.vmem %s4074_s15, 8192  ;;  %p4076_p6 = scmp.lt.s32.totalorder %s4637_s9, %s4074_s15 }
 0x105   : > { %p4071_p1 = pnand %p4069_p12, %p4055_p8  ;;  %p4077_p13 = scmp.lt.s32.totalorder %s4075_s11, %s4068_s18 }
 0x107   : > { %p4072_p10 = pneg %p4071_p1  ;;  %p4078_p0 = por %p4077_p13, %p4076_p6 }
 0x109   : > { %p4079_p2 = pnand %p4078_p0, %p4072_p10 }
 0x10b   : > { %4082 = shalt.err (!%p4079_p2)
}
 0x10c   : > { %s4273_s21 = smov 256   ;;  %s4274_s19 = smov 16  }
 0x10d   : > { %s5261_s0 = scalar_lea.sflag [#allocation3], %s4620_s26  ;;  %s620_s22 = sand.u32 1, %s4259_s30  }
 0x10e   : > { %3539 = dma.hbm_to_vmem [thread:$0]  (!%p4633_p11), %s4631_s7, 4096, %s4637_s9, %s5261_s0, %s4273_s21, %s4273_s21, %s4274_s19  }
 0x10f   : > { %s2963_s4 = sshll.u32 %s4620_s26, 7  ;;  %s3135_s15 = sshll.u32 %s4259_s30, 11 }
 0x110   : > { %s624_s18 = scalar_lea.vmem [#allocation5], %s2963_s4  ;;  %s5262_s10 = sld [smem:[#allocation30_spill]] }
 0x111   : > { %s631_s11 = sshll.u32 %s624_s18, 4  ;;  %s4677_s14 = scalar_lea.sflag [#allocation6], %s620_s22  ;;  %s4675_s11 = int_to_ptr.vmem [resolvable:$true] %s631_s11 }
 0x116   : > { %s4673_s12 = scalar_lea.hbm %s5262_s10, %s3135_s15  ;;  %s4088_s6 = scalar_lea.hbm %s5262_s10, 4096 }
 0x117   : > { %s4083_s16 = scalar_lea.hbm %s4673_s12, 2048  ;;  %p4089_p5 = scmp.lt.u32.totalorder %s4673_s12, %s5262_s10 }
 0x118   : > { %p4084_p6 = scmp.ne.s32.totalorder %s4673_s12, %s4083_s16  ;;  %p4090_p9 = scmp.lt.u32.totalorder %s4088_s6, %s4083_s16 }
 0x119   : > { %p4092_p12 = scmp.lt.u32.totalorder %s4083_s16, %s4673_s12 }
 0x11a   : > { %p4086_p10 = pnand %p4084_p6, %p4055_p8  ;;  %p4091_p4 = por %p4090_p9, %p4089_p5 }
 0x11c   : > { %p4087_p3 = pneg %p4086_p10  ;;  %p4093_p1 = por %p4092_p12, %p4091_p4 }
 0x11e   : > { %p4094_p13 = pnand %p4093_p1, %p4087_p3 }
 0x120   : > { %4097 = shalt.err (!%p4094_p13)
}
 0x121   : > { %s4098_s9 = scalar_lea.vmem %s4675_s11, 2048  ;;  %s4275_s21 = smov [#allocation5]  }
 0x122   : > { %p4099_p0 = scmp.ne.s32.totalorder %s4675_s11, %s4098_s9  ;;  %s4103_s19 = sshll.u32 %s4275_s21, 4  ;;  %s4104_s19 = int_to_ptr.vmem [resolvable:$false] %s4103_s19 }
 0x123   : > { %s4105_s0 = scalar_lea.vmem %s4104_s19, 4096  ;;  %p4106_p10 = scmp.lt.s32.totalorder %s4675_s11, %s4104_s19 }
 0x124   : > { %p4101_p2 = pnand %p4099_p0, %p4055_p8  ;;  %p4107_p5 = scmp.lt.s32.totalorder %s4105_s0, %s4098_s9 }
 0x126   : > { %p4102_p6 = pneg %p4101_p2  ;;  %p4108_p9 = por %p4107_p5, %p4106_p10 }
 0x128   : > { %p4109_p4 = pnand %p4108_p9, %p4102_p6 }
 0x12a   : > { %4112 = shalt.err (!%p4109_p4)
}
 0x12b   : > { %s5263_s16 = smov 8   ;;  %s5264_s22 = smov 128  }
 0x12c   : > { %3542 = dma.hbm_to_vmem [thread:$0]  (!%p4633_p11), %s4673_s12, 2048, %s4675_s11, %s4677_s14, %s5264_s22, %s5264_s22, %s5263_s16  }
 0x12d   : > { %p5265_p8 = scmp.ne.s32.totalorder %s5245_s20, 0 }
 0x12e   : > { %s4709_s15 = sand.u32 (!%p5265_p8), 1, %s4251_s28  }
 0x12f   : > { %643 = sbr.rel (%p5265_p8) target bundleno = 1815 (0x717), region = 84  ;;  %s2967_s18 = sshll.u32 (!%p5265_p8), %s4709_s15, 8 }
 0x130   : > { %s646_s4 = scalar_lea.sflag (!%p5265_p8), [#allocation3], %s4709_s15  ;;  %s4713_s26 = scalar_lea.vmem (!%p5265_p8), [#allocation2], %s2967_s18 }
 0x136   : > { %4214 = dma.done.wait (%p4608_p7), %s646_s4, 4096  }
 0x137   : > { %4216 = vsyncadd (%p4608_p7), %s646_s4, 4294963200  ;;  %s654_s12 = sand.u32 1, %s4398_s1   ;;  %s4721_s14 = sshll.u32 %s4709_s15, 7 }
 0x138   : > { %s655_s20 = scalar_lea.sflag [#allocation6], %s654_s12  ;;  %s4726_s17 = scalar_lea.vmem [#allocation5], %s4721_s14 }
 0x139   : > { %4218 = dma.done.wait (%p4608_p7), %s655_s20, 2048  }
 0x13a   : > { %4220 = vsyncadd (%p4608_p7), %s655_s20, 4294965248  ;;  %p5266_p11 = scmp.eq.s32.totalorder %s4398_s1, 0 }
 0x13c   : > { %4222 = dma.done.wait (%p5266_p11), [#allocation6], 2048   ;;  %p5267_p3 = pmov %p5266_p11 }
 0x13e   : > { %4224 = vsyncadd (%p5267_p3), [#allocation6], 4294965248  ;;  %p5268_p12 = pmov %p5267_p3 }
 0x13f   : > { %p5269_p1 = pmov %p5267_p3 }
 0x140   : > { %4226 = dma.done.wait (%p5268_p12), [#allocation9], 2048  }
 0x141   : > { %4228 = vsyncadd (%p5269_p1), [#allocation9], 4294965248  ;;  %p5270_p13 = pmov %p5269_p1 }
 0x142   : > { %p5271_p0 = pmov %p5269_p1 }
 0x143   : > { %4230 = dma.done.wait (%p5270_p13), [#allocation12], 2048  }
 0x144   : > { %4232 = vsyncadd (%p5271_p0), [#allocation12], 4294965248  ;;  %p5272_p7 = pmov %p5271_p0 }
 0x145   : > { %p5273_p2 = pmov %p5271_p0 }
 0x146   : > { %4234 = dma.done.wait (%p5272_p7), [#allocation15], 3072  }
 0x147   : > { %4236 = vsyncadd (%p5273_p2), [#allocation15], 4294964224  ;;  %v3617_v0 = vld [vmem:[#allocation7 + $0x40] sm:$0xff]   ;;  %v3619_v2 = vld [vmem:[#allocation7 + $0x48] sm:$0xff]   ;;  %s5274_s21 = sld [smem:[#allocation34_spill]]  ;;  %s5275_s16 = sld [smem:[#allocation36_spill]] }
 0x148   : > { %v3618_v1 = vld [vmem:[#allocation7] sm:$0xff]   ;;  %3156 = vmatprep.subr.bf16.mxu0 %v3617_v0  ;;  %v3620_v3 = vld [vmem:[#allocation7 + $0x8] sm:$0xff]   ;;  %v3621_v4 = vld [vmem:[#allocation7 + $0x50] sm:$0xff]   ;;  %s4841_s22 = scalar_lea.vmem [#allocation18], %s4721_s14  ;;  %s4856_s18 = scalar_lea.vmem [#allocation20], %s4721_s14 }
 0x149   : > { %3157 = vmatpush3.bf16.msra.mxu0 %v3618_v1  ;;  %v3622_v5 = vld [vmem:[#allocation7 + $0x10] sm:$0xff]   ;;  %v3623_v6 = vld [vmem:[#allocation7 + $0x58] sm:$0xff]   ;;  %v3625_v8 = vld [vmem:[#allocation7 + $0x60] sm:$0xff]   ;;  %s5276_s20 = sld [smem:[#allocation38_spill]]  ;;  %s5277_s11 = sld [smem:[#allocation40_spill]] }
 0x14a   : > { %3158 = vmatprep.subr.bf16.mxu0 %v3619_v2  ;;  %v3624_v7 = vld [vmem:[#allocation7 + $0x18] sm:$0xff]   ;;  %v3626_v9 = vld [vmem:[#allocation7 + $0x20] sm:$0xff]   ;;  %v3627_v10 = vld [vmem:[#allocation7 + $0x68] sm:$0xff]   ;;  %s5007_s6 = sshll.u32 %s4398_s1, 11  ;;  %s2710_s8 = sshll.u32 %s4841_s22, 4  ;;  %s5016_s8 = int_to_ptr.vmem [resolvable:$true] %s2710_s8 }
 0x14b   : > { %v761_v11 = vld [vmem:[%s4713_s26 + $0x8] sm:$0xff]  ;;  %v763_v12 = vld [vmem:[%s4713_s26 + $0x18] sm:$0xff]  ;;  %v3629_v15 = vld [vmem:[#allocation7 + $0x70] sm:$0xff]   ;;  %s5020_s0 = scalar_lea.sflag [#allocation19], %s654_s12  ;;  %p5279_p10 = scmp.ne.s32.totalorder %s5257_s13, 0 }
 0x14c   : > { %v793_v13 = vpack.c.bf16 %v763_v12, %v761_v11  ;;  %v3628_v14 = vld [vmem:[#allocation7 + $0x28] sm:$0xff]   ;;  %v3630_v16 = vld [vmem:[#allocation7 + $0x30] sm:$0xff]   ;;  %v3631_v17 = vld [vmem:[#allocation7 + $0x78] sm:$0xff]   ;;  %s4277_s4 = smov [#allocation18]  }
 0x14d   : > { %3159 = vmatpush3.bf16.msra.mxu0 %v3620_v3  ;;  %v3632_v18 = vld [vmem:[#allocation7 + $0x38] sm:$0xff]   ;;  %v760_v19 = vld [vmem:[%s4713_s26] sm:$0xff]  ;;  %v762_v20 = vld [vmem:[%s4713_s26 + $0x10] sm:$0xff] }
 0x14e   : > { %3160 = vmatprep.subr.bf16.mxu0 %v3621_v4  ;;  %975 = vmatprep.mubr.bf16.mxu0 %v793_v13  ;;  %v765_v21 = vld [vmem:[%s4713_s26 + $0x28] sm:$0xff]  ;;  %v767_v22 = vld [vmem:[%s4713_s26 + $0x38] sm:$0xff]  ;;  %v3633_v23 = vld [vmem:[#allocation8] sm:$0xff]   ;;  %v792_v26 = vpack.c.bf16 %v762_v20, %v760_v19 }
 0x14f   : > { %v3634_v24 = vld [vmem:[#allocation8 + $0x8] sm:$0xff]   ;;  %3300 = vmatprep.subr.bf16.mxu1 %v3633_v23  ;;  %v3635_v25 = vld [vmem:[#allocation8 + $0x10] sm:$0xff]   ;;  %v795_v27 = vpack.c.bf16 %v767_v22, %v765_v21  ;;  %v764_v28 = vld [vmem:[%s4713_s26 + $0x20] sm:$0xff] }
 0x150   : > { %3301 = vmatpush3.bf16.msra.mxu1 %v3633_v23  ;;  %v766_v29 = vld [vmem:[%s4713_s26 + $0x30] sm:$0xff]  ;;  %v769_v30 = vld [vmem:[%s4713_s26 + $0x48] sm:$0xff]  ;;  %v771_v31 = vld [vmem:[%s4713_s26 + $0x58] sm:$0xff] }
 0x151   : > { %3161 = vmatpush3.bf16.msra.mxu0 %v3622_v5  ;;  %3302 = vmatprep.subr.bf16.mxu1 %v3634_v24  ;;  %v794_v32 = vpack.c.bf16 %v766_v29, %v764_v28  ;;  %v797_v33 = vpack.c.bf16 %v771_v31, %v769_v30  ;;  %v768_v34 = vld [vmem:[%s4713_s26 + $0x40] sm:$0xff]  ;;  %v770_v35 = vld [vmem:[%s4713_s26 + $0x50] sm:$0xff]  ;;  %v773_v36 = vld [vmem:[%s4713_s26 + $0x68] sm:$0xff] }
 0x152   : > { %3162 = vmatprep.subr.bf16.mxu0 %v3623_v6  ;;  %v775_v37 = vld [vmem:[%s4713_s26 + $0x78] sm:$0xff]  ;;  %v796_v38 = vpack.c.bf16 %v770_v35, %v768_v34  ;;  %v772_v40 = vld [vmem:[%s4713_s26 + $0x60] sm:$0xff]  ;;  %v774_v41 = vld [vmem:[%s4713_s26 + $0x70] sm:$0xff] }
 0x153   : > { %v799_v39 = vpack.c.bf16 %v775_v37, %v773_v36  ;;  %v777_v42 = vld [vmem:[%s4713_s26 + $0x88] sm:$0xff]  ;;  %v779_v43 = vld [vmem:[%s4713_s26 + $0x98] sm:$0xff]  ;;  %v798_v44 = vpack.c.bf16 %v774_v41, %v772_v40  ;;  %v776_v46 = vld [vmem:[%s4713_s26 + $0x80] sm:$0xff] }
 0x154   : > { %3303 = vmatpush3.bf16.msra.mxu1 %v3634_v24  ;;  %v801_v45 = vpack.c.bf16 %v779_v43, %v777_v42  ;;  %v778_v47 = vld [vmem:[%s4713_s26 + $0x90] sm:$0xff]  ;;  %v781_v48 = vld [vmem:[%s4713_s26 + $0xa8] sm:$0xff]  ;;  %v783_v49 = vld [vmem:[%s4713_s26 + $0xb8] sm:$0xff] }
 0x155   : > { %3163 = vmatpush3.bf16.msra.mxu0 %v3624_v7  ;;  %3304 = vmatprep.subr.bf16.mxu1 %v3635_v25  ;;  %v800_v50 = vpack.c.bf16 %v778_v47, %v776_v46  ;;  %v803_v51 = vpack.c.bf16 %v783_v49, %v781_v48  ;;  %v780_v52 = vld [vmem:[%s4713_s26 + $0xa0] sm:$0xff]  ;;  %v782_v53 = vld [vmem:[%s4713_s26 + $0xb0] sm:$0xff]  ;;  %v785_v54 = vld [vmem:[%s4713_s26 + $0xc8] sm:$0xff] }
 0x156   : > { %3164 = vmatprep.subr.bf16.mxu0 %v3625_v8  ;;  %v787_v55 = vld [vmem:[%s4713_s26 + $0xd8] sm:$0xff]  ;;  %v802_v56 = vpack.c.bf16 %v782_v53, %v780_v52  ;;  %v784_v58 = vld [vmem:[%s4713_s26 + $0xc0] sm:$0xff]  ;;  %v786_v59 = vld [vmem:[%s4713_s26 + $0xd0] sm:$0xff] }
 0x157   : > { %v805_v57 = vpack.c.bf16 %v787_v55, %v785_v54  ;;  %v789_v60 = vld [vmem:[%s4713_s26 + $0xe8] sm:$0xff]  ;;  %v791_v61 = vld [vmem:[%s4713_s26 + $0xf8] sm:$0xff]  ;;  %v804_v62 = vpack.c.bf16 %v786_v59, %v784_v58  ;;  %v788_v0 = vld [vmem:[%s4713_s26 + $0xe0] sm:$0xff] }
 0x158   : > { %3305 = vmatpush3.bf16.msra.mxu1 %v3635_v25  ;;  %v807_v63 = vpack.c.bf16 %v791_v61, %v789_v60  ;;  %v790_v1 = vld [vmem:[%s4713_s26 + $0xf0] sm:$0xff]  ;;  %v3636_v3 = vld [vmem:[#allocation8 + $0x18] sm:$0xff]   ;;  %v3637_v4 = vld [vmem:[#allocation8 + $0x20] sm:$0xff]  }
 0x159   : > { %3165 = vmatpush3.bf16.msra.mxu0 %v3626_v9  ;;  %v806_v2 = vpack.c.bf16 %v790_v1, %v788_v0  ;;  %3306 = vmatprep.subr.bf16.mxu1 %v3636_v3  ;;  %v3638_v5 = vld [vmem:[#allocation8 + $0x28] sm:$0xff]   ;;  %v3639_v6 = vld [vmem:[#allocation8 + $0x30] sm:$0xff]   ;;  %v3640_v7 = vld [vmem:[#allocation8 + $0x38] sm:$0xff]  }
 0x15a   : > { %3166 = vmatprep.subr.bf16.mxu0 %v3627_v10  ;;  %v3641_v8 = vld [vmem:[#allocation11] sm:$0xff]   ;;  %v3642_v9 = vld [vmem:[#allocation11 + $0x8] sm:$0xff]   ;;  %v3643_v11 = vld [vmem:[#allocation11 + $0x10] sm:$0xff]  }
 0x15b   : > { %v3645_v10 = vld [vmem:[#allocation10] sm:$0xff]   ;;  %v3644_v12 = vld [vmem:[#allocation11 + $0x18] sm:$0xff]   ;;  %v3646_v42 = vld [vmem:[#allocation10 + $0x8] sm:$0xff]  }
 0x15c   : > { %3307 = vmatpush3.bf16.msra.mxu1 %v3636_v3  ;;  %v3647_v13 = vld [vmem:[#allocation11 + $0x20] sm:$0xff]   ;;  %v3648_v47 = vld [vmem:[#allocation10 + $0x10] sm:$0xff]   ;;  %v3649_v55 = vld [vmem:[#allocation10 + $0x18] sm:$0xff]  }
 0x15d   : > { %3167 = vmatpush3.bf16.msra.mxu0 %v3628_v14  ;;  %3308 = vmatprep.subr.bf16.mxu1 %v3637_v4  ;;  %v3650_v14 = vld [vmem:[#allocation11 + $0x28] sm:$0xff]   ;;  %v3651_v60 = vld [vmem:[#allocation10 + $0x20] sm:$0xff]  }
 0x15e   : > { %3168 = vmatprep.subr.bf16.mxu0 %v3629_v15 }
 0x160   : > { %3309 = vmatpush3.bf16.msra.mxu1 %v3637_v4  ;;  %v3652_v4 = vld [vmem:[#allocation10 + $0x28] sm:$0xff]  }
 0x161   : > { %3169 = vmatpush3.bf16.msra.mxu0 %v3630_v16  ;;  %3310 = vmatprep.subr.bf16.mxu1 %v3638_v5 }
 0x162   : > { %3170 = vmatprep.subr.bf16.mxu0 %v3631_v17  ;;  %v4783_v17 = vld [vmem:[%s5198_s3] ss:$0 sm:$0xff] }
 0x164   : > { %3311 = vmatpush3.bf16.msra.mxu1 %v3638_v5 }
 0x165   : > { %3171 = vmatpush3.bf16.msra.mxu0 %v3632_v18  ;;  %3312 = vmatprep.subr.bf16.mxu1 %v3639_v6 }
 0x166   : > { %3364 = vmatprep.subr.bf16.mxu0 %v3641_v8 }
 0x168   : > { %976 = vmatmul.mubr.bf16.vlgmr.msra.gmra.mrb[0].mxu0 %v792_v26  ;;  %3313 = vmatpush3.bf16.msra.mxu1 %v3639_v6 }
 0x169   : > { %983 = vmatprep.mubr.bf16.mxu0 %v795_v27  ;;  %3314 = vmatprep.subr.bf16.mxu1 %v3640_v7 }
 0x16a   : > { %3365 = vmatpush3.bf16.msra.mxu0 %v3641_v8 }
 0x16b   : > { %3366 = vmatprep.subr.bf16.mxu0 %v3642_v9 }
 0x16c   : > { %3315 = vmatpush3.bf16.msra.mxu1 %v3640_v7 }
 0x16d   : > { %3332 = vmatprep.subr.bf16.mxu1 %v3645_v10 }
 0x16e   : > { %3367 = vmatpush3.bf16.msra.mxu0 %v3642_v9 }
 0x16f   : > { %3368 = vmatprep.subr.bf16.mxu0 %v3643_v11 }
 0x170   : > { %984 = vmatmul.mubr.bf16.gmra.mrb[4].mxu0 %v794_v32 }
 0x171   : > { %991 = vmatprep.mubr.bf16.mxu0 %v797_v33 }
 0x172   : > { %3369 = vmatpush3.bf16.msra.mxu0 %v3643_v11 }
 0x173   : > { %3370 = vmatprep.subr.bf16.mxu0 %v3644_v12 }
 0x176   : > { %3371 = vmatpush3.bf16.msra.mxu0 %v3644_v12 }
 0x177   : > { %3372 = vmatprep.subr.bf16.mxu0 %v3647_v13 }
 0x178   : > { %992 = vmatmul.mubr.bf16.gmra.mrb[8].mxu0 %v796_v38 }
 0x179   : > { %999 = vmatprep.mubr.bf16.mxu0 %v799_v39 }
 0x17a   : > { %3373 = vmatpush3.bf16.msra.mxu0 %v3647_v13 }
 0x17b   : > { %3374 = vmatprep.subr.bf16.mxu0 %v3650_v14 }
 0x17e   : > { %3375 = vmatpush3.bf16.msra.mxu0 %v3650_v14 }
 0x180   : > { %1000 = vmatmul.mubr.bf16.gmra.mrb[12].mxu0 %v798_v44 }
 0x181   : > { %1007 = vmatprep.mubr.bf16.mxu0 %v801_v45 }
 0x188   : > { %1008 = vmatmul.mubr.bf16.gmra.mrb[16].mxu0 %v800_v50 }
 0x189   : > { %1015 = vmatprep.mubr.bf16.mxu0 %v803_v51 }
 0x190   : > { %1016 = vmatmul.mubr.bf16.gmra.mrb[20].mxu0 %v802_v56 }
 0x191   : > { %1023 = vmatprep.mubr.bf16.mxu0 %v805_v57 }
 0x198   : > { %1024 = vmatmul.mubr.bf16.gmra.mrb[24].mxu0 %v804_v62 }
 0x199   : > { %1031 = vmatprep.mubr.bf16.mxu0 %v807_v63 }
 0x1a0   : > { %1032 = vmatmul.mubr.bf16.gmra.mrb[28].mxu0 %v806_v2 }
 0x23b   : > { %v3172_v15 = vpop.f32.mrb[0].mxu0 }
 0x23c   : > { %v3173_v16 = vpop.f32.mrb[1].mxu0 }
 0x23d   : > { %v3174_v18 = vadd.f32 %v3173_v16, %v3172_v15  ;;  %v3175_v19 = vpop.f32.mrb[2].mxu0 }
 0x23e   : > { %v3176_v20 = vpop.f32.mrb[3].mxu0 }
 0x23f   : > { %v3177_v21 = vadd.f32 %v3176_v20, %v3175_v19  ;;  %v978_v22 = vadd.f32 %v3174_v18, %v4783_v17 }
 0x241   : > { %v981_v23 = vadd.f32 %v3177_v21, %v4783_v17  ;;  %v1040_v25 = vmax.f32 %v978_v22, 0.0 }
 0x243   : > { %v3178_v24 = vpop.f32.mrb[4].mxu0  ;;  %v1041_v26 = vmax.f32 %v981_v23, 0.0 }
 0x244   : > { %v3179_v27 = vpop.f32.mrb[5].mxu0 }
 0x245   : > { %v3180_v28 = vadd.f32 %v3179_v27, %v3178_v24  ;;  %v3181_v29 = vpop.f32.mrb[6].mxu0  ;;  %v1056_v30 = vpack.c.bf16 %v1041_v26, %v1040_v25 }
 0x246   : > { %v3182_v31 = vpop.f32.mrb[7].mxu0 }
 0x247   : > { %v986_v32 = vadd.f32 %v3180_v28, %v4783_v17  ;;  %v3183_v33 = vadd.f32 %v3182_v31, %v3181_v29  ;;  %3316 = vmatprep.mubr.bf16.mxu1 %v1056_v30 }
 0x249   : > { %v989_v34 = vadd.f32 %v3183_v33, %v4783_v17  ;;  %v1042_v35 = vmax.f32 %v986_v32, 0.0 }
 0x24b   : > { %v1043_v36 = vmax.f32 %v989_v34, 0.0  ;;  %v3184_v37 = vpop.f32.mrb[8].mxu0 }
 0x24c   : > { %v3185_v38 = vpop.f32.mrb[9].mxu0 }
 0x24d   : > { %v3186_v39 = vadd.f32 %v3185_v38, %v3184_v37  ;;  %v3187_v40 = vpop.f32.mrb[10].mxu0  ;;  %v1057_v41 = vpack.c.bf16 %v1043_v36, %v1042_v35 }
 0x24e   : > { %v3188_v43 = vpop.f32.mrb[11].mxu0 }
 0x24f   : > { %v994_v44 = vadd.f32 %v3186_v39, %v4783_v17  ;;  %v3189_v45 = vadd.f32 %v3188_v43, %v3187_v40  ;;  %3317 = vmatmul.mubr.bf16.vlgmr.msra.gmra.mrb[0].mxu1 %v1057_v41 }
 0x250   : > { %3333 = vmatpush3.bf16.msra.mxu1 %v3645_v10 }
 0x251   : > { %v997_v46 = vadd.f32 %v3189_v45, %v4783_v17  ;;  %3334 = vmatprep.subr.bf16.mxu1 %v3646_v42  ;;  %v1044_v48 = vmax.f32 %v994_v44, 0.0 }
 0x253   : > { %v1045_v49 = vmax.f32 %v997_v46, 0.0  ;;  %v3190_v50 = vpop.f32.mrb[12].mxu0  ;;  %v3653_v46 = vld [vmem:[#allocation11 + $0x30] sm:$0xff]  }
 0x254   : > { %v3191_v51 = vpop.f32.mrb[13].mxu0  ;;  %3335 = vmatpush3.bf16.msra.mxu1 %v3646_v42  ;;  %3376 = vmatprep.subr.bf16.mxu0 %v3653_v46 }
 0x255   : > { %v3192_v52 = vadd.f32 %v3191_v51, %v3190_v50  ;;  %v3193_v53 = vpop.f32.mrb[14].mxu0  ;;  %v1058_v54 = vpack.c.bf16 %v1045_v49, %v1044_v48  ;;  %3336 = vmatprep.subr.bf16.mxu1 %v3648_v47  ;;  %3377 = vmatpush3.bf16.msra.mxu0 %v3653_v46  ;;  %v3655_v48 = vld [vmem:[#allocation10 + $0x38] sm:$0xff]   ;;  %v3657_v50 = vld [vmem:[#allocation13] sm:$0xff]  }
 0x256   : > { %v3194_v56 = vpop.f32.mrb[15].mxu0  ;;  %v3656_v49 = vld [vmem:[#allocation11 + $0x38] sm:$0xff]  }
 0x257   : > { %v1002_v57 = vadd.f32 %v3192_v52, %v4783_v17  ;;  %v3195_v58 = vadd.f32 %v3194_v56, %v3193_v53  ;;  %3320 = vmatprep.mubr.bf16.mxu1 %v1058_v54  ;;  %3378 = vmatprep.subr.bf16.mxu0 %v3656_v49  ;;  %v3660_v46 = vld [vmem:[#allocation13 + $0x18] sm:$0xff]  }
 0x258   : > { %3337 = vmatpush3.bf16.msra.mxu1 %v3648_v47  ;;  %v3654_v47 = vld [vmem:[#allocation10 + $0x30] sm:$0xff]  }
 0x259   : > { %v1005_v59 = vadd.f32 %v3195_v58, %v4783_v17  ;;  %3338 = vmatprep.subr.bf16.mxu1 %v3649_v55  ;;  %v1046_v61 = vmax.f32 %v1002_v57, 0.0  ;;  %3379 = vmatpush3.bf16.msra.mxu0 %v3656_v49  ;;  %v3663_v49 = vld [vmem:[#allocation13 + $0x30] sm:$0xff]  }
 0x25b   : > { %v1047_v62 = vmax.f32 %v1005_v59, 0.0  ;;  %v3196_v63 = vpop.f32.mrb[16].mxu0 }
 0x25c   : > { %v3197_v0 = vpop.f32.mrb[17].mxu0  ;;  %3339 = vmatpush3.bf16.msra.mxu1 %v3649_v55 }
 0x25d   : > { %v3198_v1 = vadd.f32 %v3197_v0, %v3196_v63  ;;  %v3199_v2 = vpop.f32.mrb[18].mxu0  ;;  %v1059_v3 = vpack.c.bf16 %v1047_v62, %v1046_v61  ;;  %3340 = vmatprep.subr.bf16.mxu1 %v3651_v60 }
 0x25e   : > { %v3200_v5 = vpop.f32.mrb[19].mxu0 }
 0x25f   : > { %v1010_v6 = vadd.f32 %v3198_v1, %v4783_v17  ;;  %v3201_v7 = vadd.f32 %v3200_v5, %v3199_v2  ;;  %3321 = vmatmul.mubr.bf16.gmra.mrb[4].mxu1 %v1059_v3 }
 0x260   : > { %3341 = vmatpush3.bf16.msra.mxu1 %v3651_v60 }
 0x261   : > { %v1013_v8 = vadd.f32 %v3201_v7, %v4783_v17  ;;  %3342 = vmatprep.subr.bf16.mxu1 %v3652_v4  ;;  %v1048_v9 = vmax.f32 %v1010_v6, 0.0 }
 0x263   : > { %v1049_v10 = vmax.f32 %v1013_v8, 0.0  ;;  %v3202_v11 = vpop.f32.mrb[20].mxu0 }
 0x264   : > { %v3203_v12 = vpop.f32.mrb[21].mxu0  ;;  %3343 = vmatpush3.bf16.msra.mxu1 %v3652_v4 }
 0x265   : > { %v3204_v13 = vadd.f32 %v3203_v12, %v3202_v11  ;;  %v3205_v14 = vpop.f32.mrb[22].mxu0  ;;  %v1060_v15 = vpack.c.bf16 %v1049_v10, %v1048_v9  ;;  %3344 = vmatprep.subr.bf16.mxu1 %v3654_v47 }
 0x266   : > { %v3206_v16 = vpop.f32.mrb[23].mxu0 }
 0x267   : > { %v1018_v18 = vadd.f32 %v3204_v13, %v4783_v17  ;;  %v3207_v19 = vadd.f32 %v3206_v16, %v3205_v14  ;;  %3324 = vmatprep.mubr.bf16.mxu1 %v1060_v15 }
 0x268   : > { %3345 = vmatpush3.bf16.msra.mxu1 %v3654_v47  ;;  %v3661_v47 = vld [vmem:[#allocation13 + $0x20] sm:$0xff]  }
 0x269   : > { %v1021_v20 = vadd.f32 %v3207_v19, %v4783_v17  ;;  %v1050_v21 = vmax.f32 %v1018_v18, 0.0  ;;  %3346 = vmatprep.subr.bf16.mxu1 %v3655_v48 }
 0x26b   : > { %v1051_v22 = vmax.f32 %v1021_v20, 0.0  ;;  %v3208_v23 = vpop.f32.mrb[24].mxu0 }
 0x26c   : > { %v3209_v24 = vpop.f32.mrb[25].mxu0  ;;  %3347 = vmatpush3.bf16.msra.mxu1 %v3655_v48  ;;  %v3662_v48 = vld [vmem:[#allocation13 + $0x28] sm:$0xff]  }
 0x26d   : > { %v3210_v25 = vadd.f32 %v3209_v24, %v3208_v23  ;;  %v3211_v26 = vpop.f32.mrb[26].mxu0  ;;  %v1061_v27 = vpack.c.bf16 %v1051_v22, %v1050_v21  ;;  %3396 = vmatprep.subr.bf16.mxu1 %v3657_v50 }
 0x26e   : > { %v3212_v28 = vpop.f32.mrb[27].mxu0 }
 0x26f   : > { %v1026_v29 = vadd.f32 %v3210_v25, %v4783_v17  ;;  %v3213_v30 = vadd.f32 %v3212_v28, %v3211_v26  ;;  %3325 = vmatmul.mubr.bf16.gmra.mrb[8].mxu1 %v1061_v27 }
 0x271   : > { %v1029_v31 = vadd.f32 %v3213_v30, %v4783_v17  ;;  %v1052_v32 = vmax.f32 %v1026_v29, 0.0 }
 0x273   : > { %v1053_v33 = vmax.f32 %v1029_v31, 0.0  ;;  %v3214_v34 = vpop.f32.mrb[28].mxu0 }
 0x274   : > { %v3215_v35 = vpop.f32.mrb[29].mxu0 }
 0x275   : > { %v3216_v36 = vadd.f32 %v3215_v35, %v3214_v34  ;;  %v3217_v37 = vpop.f32.mrb[30].mxu0  ;;  %v1062_v38 = vpack.c.bf16 %v1053_v33, %v1052_v32 }
 0x276   : > { %v3218_v39 = vpop.f32.mrb[31].mxu0 }
 0x277   : > { %v1034_v40 = vadd.f32 %v3216_v36, %v4783_v17  ;;  %v3219_v41 = vadd.f32 %v3218_v39, %v3217_v37  ;;  %3328 = vmatprep.mubr.bf16.mxu1 %v1062_v38 }
 0x279   : > { %v1037_v42 = vadd.f32 %v3219_v41, %v4783_v17  ;;  %v1054_v43 = vmax.f32 %v1034_v40, 0.0  ;;  %v4804_v17 = vld [vmem:[%s5200_s5] ss:$0 sm:$0xff] }
 0x27b   : > { %v1055_v44 = vmax.f32 %v1037_v42, 0.0 }
 0x27d   : > { %v1063_v45 = vpack.c.bf16 %v1055_v44, %v1054_v43  ;;  %v3658_v44 = vld [vmem:[#allocation13 + $0x8] sm:$0xff]  }
 0x27f   : > { %3329 = vmatmul.mubr.bf16.gmra.mrb[12].mxu1 %v1063_v45  ;;  %v3659_v45 = vld [vmem:[#allocation13 + $0x10] sm:$0xff]  }
 0x322   : > { %v3318_v51 = vpop.f32.mrb[0].mxu1 }
 0x323   : > { %v1178_v52 = vadd.f32 %v3318_v51, %v4804_v17  ;;  %v1169_v53 = vpop.f32.mrb[1].mxu1  ;;  %v3666_v51 = vld [vmem:[#allocation14 + $0x8] sm:$0xff]  }
 0x324   : > { %v1170_v54 = vadd.f32 %v4804_v17, %v1169_v53  ;;  %v3319_v55 = vpop.f32.mrb[2].mxu1  ;;  %v3668_v53 = vld [vmem:[#allocation14 + $0x18] sm:$0xff]  }
 0x325   : > { %v1181_v56 = vadd.f32 %v3319_v55, %v4804_v17  ;;  %v1172_v57 = vpop.f32.mrb[3].mxu1  ;;  %v1234_v59 = vmax.f32 %v1178_v52, 0.0  ;;  %v3667_v52 = vld [vmem:[#allocation14 + $0x10] sm:$0xff]   ;;  %v3670_v55 = vld [vmem:[#allocation14 + $0x28] sm:$0xff]  }
 0x326   : > { %v1173_v58 = vadd.f32 %v4804_v17, %v1172_v57  ;;  %v1232_v61 = vmax.f32 %v1170_v54, 0.0  ;;  %v3669_v54 = vld [vmem:[#allocation14 + $0x20] sm:$0xff]  }
 0x327   : > { %v1235_v60 = vmax.f32 %v1181_v56, 0.0  ;;  %v4825_v56 = vld [vmem:[%s5274_s21] ss:$0 sm:$0xff]  ;;  %s5278_s21 = sld [smem:[#allocation44_spill]] }
 0x328   : > { %v1233_v62 = vmax.f32 %v1173_v58, 0.0  ;;  %v4830_v57 = vld [vmem:[%s5275_s16] ss:$0 sm:$0xff]  ;;  %s4113_s16 = scalar_lea.vmem %s5016_s8, 2048 }
 0x329   : > { %v1249_v63 = vpack.c.bf16 %v1235_v60, %v1234_v59  ;;  %p4114_p6 = scmp.ne.s32.totalorder %s5016_s8, %s4113_s16 }
 0x32a   : > { %v1248_v0 = vpack.c.bf16 %v1233_v62, %v1232_v61 }
 0x32b   : > { %p4115_p5 = pnand %p4114_p6, %p5279_p10 }
 0x32c   : > { %3348 = vmatprep.mubr.bf16.mxu1 %v1248_v0  ;;  %3380 = vmatprep.mubr.bf16.mxu0 %v1248_v0 }
 0x32d   : > { %3349 = vmatmul.mubr.bf16.vlgmr.msra.gmra.mrb[16].mxu1 %v1249_v63  ;;  %3381 = vmatmul.mubr.bf16.vlgmr.msra.gmra.mrb[32].mxu0 %v1249_v63  ;;  %s5014_s19 = scalar_lea.hbm %s5278_s21, %s5007_s6  ;;  %p4116_p9 = pneg %p4115_p5 }
 0x32e   : > { %3397 = vmatpush3.bf16.msra.mxu1 %v3657_v50  ;;  %v3664_v50 = vld [vmem:[#allocation13 + $0x38] sm:$0xff]  }
 0x32f   : > { %3398 = vmatprep.subr.bf16.mxu1 %v3658_v44 }
 0x332   : > { %v3322_v1 = vpop.f32.mrb[4].mxu1  ;;  %3399 = vmatpush3.bf16.msra.mxu1 %v3658_v44 }
 0x333   : > { %v1194_v2 = vadd.f32 %v3322_v1, %v4804_v17  ;;  %v1185_v3 = vpop.f32.mrb[5].mxu1  ;;  %3400 = vmatprep.subr.bf16.mxu1 %v3659_v45 }
 0x334   : > { %v1186_v4 = vadd.f32 %v4804_v17, %v1185_v3  ;;  %v3323_v5 = vpop.f32.mrb[6].mxu1 }
 0x335   : > { %v1197_v6 = vadd.f32 %v3323_v5, %v4804_v17  ;;  %v1188_v7 = vpop.f32.mrb[7].mxu1  ;;  %v1238_v9 = vmax.f32 %v1194_v2, 0.0 }
 0x336   : > { %v1189_v8 = vadd.f32 %v4804_v17, %v1188_v7  ;;  %v1236_v11 = vmax.f32 %v1186_v4, 0.0  ;;  %3401 = vmatpush3.bf16.msra.mxu1 %v3659_v45 }
 0x337   : > { %v1239_v10 = vmax.f32 %v1197_v6, 0.0  ;;  %3402 = vmatprep.subr.bf16.mxu1 %v3660_v46 }
 0x338   : > { %v1237_v12 = vmax.f32 %v1189_v8, 0.0 }
 0x339   : > { %v1251_v13 = vpack.c.bf16 %v1239_v10, %v1238_v9 }
 0x33a   : > { %v1250_v14 = vpack.c.bf16 %v1237_v12, %v1236_v11  ;;  %3403 = vmatpush3.bf16.msra.mxu1 %v3660_v46 }
 0x33b   : > { %3404 = vmatprep.subr.bf16.mxu1 %v3661_v47 }
 0x33c   : > { %3352 = vmatprep.mubr.bf16.mxu1 %v1250_v14  ;;  %3384 = vmatprep.mubr.bf16.mxu0 %v1250_v14 }
 0x33d   : > { %3353 = vmatmul.mubr.bf16.gmra.mrb[20].mxu1 %v1251_v13  ;;  %3385 = vmatmul.mubr.bf16.gmra.mrb[36].mxu0 %v1251_v13 }
 0x33e   : > { %3405 = vmatpush3.bf16.msra.mxu1 %v3661_v47  ;;  %v1705_v47 = vld [vmem:[%s4726_s17 + $0x8] sm:$0xff] }
 0x33f   : > { %3406 = vmatprep.subr.bf16.mxu1 %v3662_v48 }
 0x342   : > { %v3326_v15 = vpop.f32.mrb[8].mxu1  ;;  %3407 = vmatpush3.bf16.msra.mxu1 %v3662_v48 }
 0x343   : > { %v1210_v16 = vadd.f32 %v3326_v15, %v4804_v17  ;;  %v1201_v18 = vpop.f32.mrb[9].mxu1  ;;  %3408 = vmatprep.subr.bf16.mxu1 %v3663_v49 }
 0x344   : > { %v1202_v19 = vadd.f32 %v4804_v17, %v1201_v18  ;;  %v3327_v20 = vpop.f32.mrb[10].mxu1 }
 0x345   : > { %v1213_v21 = vadd.f32 %v3327_v20, %v4804_v17  ;;  %v1204_v22 = vpop.f32.mrb[11].mxu1  ;;  %v1242_v24 = vmax.f32 %v1210_v16, 0.0 }
 0x346   : > { %v1205_v23 = vadd.f32 %v4804_v17, %v1204_v22  ;;  %v1240_v26 = vmax.f32 %v1202_v19, 0.0  ;;  %3409 = vmatpush3.bf16.msra.mxu1 %v3663_v49 }
 0x347   : > { %v1243_v25 = vmax.f32 %v1213_v21, 0.0  ;;  %3410 = vmatprep.subr.bf16.mxu1 %v3664_v50 }
 0x348   : > { %v1241_v27 = vmax.f32 %v1205_v23, 0.0 }
 0x349   : > { %v1253_v28 = vpack.c.bf16 %v1243_v25, %v1242_v24  ;;  %v1706_v25 = vld [vmem:[%s4726_s17 + $0x10] sm:$0xff] }
 0x34a   : > { %v1252_v29 = vpack.c.bf16 %v1241_v27, %v1240_v26  ;;  %3411 = vmatpush3.bf16.msra.mxu1 %v3664_v50 }
 0x34c   : > { %3356 = vmatprep.mubr.bf16.mxu1 %v1252_v29  ;;  %3388 = vmatprep.mubr.bf16.mxu0 %v1252_v29 }
 0x34d   : > { %3357 = vmatmul.mubr.bf16.gmra.mrb[24].mxu1 %v1253_v28  ;;  %3389 = vmatmul.mubr.bf16.gmra.mrb[40].mxu0 %v1253_v28 }
 0x352   : > { %v3330_v30 = vpop.f32.mrb[12].mxu1 }
 0x353   : > { %v1226_v31 = vadd.f32 %v3330_v30, %v4804_v17  ;;  %v1217_v32 = vpop.f32.mrb[13].mxu1 }
 0x354   : > { %v1218_v33 = vadd.f32 %v4804_v17, %v1217_v32  ;;  %v3331_v34 = vpop.f32.mrb[14].mxu1 }
 0x355   : > { %v1229_v35 = vadd.f32 %v3331_v34, %v4804_v17  ;;  %v1220_v36 = vpop.f32.mrb[15].mxu1  ;;  %v1246_v38 = vmax.f32 %v1226_v31, 0.0  ;;  %v1704_v34 = vld [vmem:[%s4726_s17] sm:$0xff] }
 0x356   : > { %v1221_v37 = vadd.f32 %v4804_v17, %v1220_v36  ;;  %v1244_v40 = vmax.f32 %v1218_v33, 0.0  ;;  %v3665_v17 = vld [vmem:[#allocation14] sm:$0xff]   ;;  %v1707_v36 = vld [vmem:[%s4726_s17 + $0x18] sm:$0xff] }
 0x357   : > { %v1247_v39 = vmax.f32 %v1229_v35, 0.0  ;;  %3428 = vmatprep.subr.bf16.mxu0 %v3665_v17 }
 0x358   : > { %v1245_v41 = vmax.f32 %v1221_v37, 0.0  ;;  %3429 = vmatpush3.bf16.msra.mxu0 %v3665_v17 }
 0x359   : > { %v1255_v42 = vpack.c.bf16 %v1247_v39, %v1246_v38  ;;  %3430 = vmatprep.subr.bf16.mxu0 %v3666_v51 }
 0x35a   : > { %v1254_v43 = vpack.c.bf16 %v1245_v41, %v1244_v40 }
 0x35c   : > { %3360 = vmatprep.mubr.bf16.mxu1 %v1254_v43  ;;  %3392 = vmatprep.mubr.bf16.mxu0 %v1254_v43 }
 0x35d   : > { %3361 = vmatmul.mubr.bf16.gmra.mrb[28].mxu1 %v1255_v42  ;;  %3393 = vmatmul.mubr.bf16.gmra.mrb[44].mxu0 %v1255_v42 }
 0x35e   : > { %3431 = vmatpush3.bf16.msra.mxu0 %v3666_v51 }
 0x35f   : > { %3432 = vmatprep.subr.bf16.mxu0 %v3667_v52 }
 0x362   : > { %3433 = vmatpush3.bf16.msra.mxu0 %v3667_v52 }
 0x363   : > { %3434 = vmatprep.subr.bf16.mxu0 %v3668_v53 }
 0x366   : > { %3435 = vmatpush3.bf16.msra.mxu0 %v3668_v53 }
 0x367   : > { %3436 = vmatprep.subr.bf16.mxu0 %v3669_v54 }
 0x36a   : > { %3437 = vmatpush3.bf16.msra.mxu0 %v3669_v54 }
 0x36b   : > { %3438 = vmatprep.subr.bf16.mxu0 %v3670_v55 }
 0x36e   : > { %3439 = vmatpush3.bf16.msra.mxu0 %v3670_v55 }
 0x400   : > { %v3350_v58 = vpop.f32.mrb[16].mxu1  ;;  %v3382_v59 = vpop.f32.mrb[32].mxu0 }
 0x401   : > { %v4833_v60 = vadd.f32 %v3350_v58, %v4825_v56  ;;  %v1538_v61 = vadd.f32 %v3382_v59, %v4830_v57  ;;  %v1361_v62 = vpop.f32.mrb[17].mxu1  ;;  %v1529_v63 = vpop.f32.mrb[33].mxu0 }
 0x402   : > { %v4837_v0 = vadd.f32 %v4825_v56, %v1361_v62  ;;  %v1530_v1 = vadd.f32 %v4830_v57, %v1529_v63  ;;  %v3351_v2 = vpop.f32.mrb[18].mxu1  ;;  %v3383_v3 = vpop.f32.mrb[34].mxu0 }
 0x403   : > { %1626 = vst [vmem:[%s4841_s22 + $0x10] sm:$0xff] %v4833_v60  ;;  %v3025_v4 = vclamps-f32 %v1538_v61, 15.0  ;;  %v4846_v5 = vadd.f32 %v3351_v2, %v4825_v56  ;;  %v1541_v6 = vadd.f32 %v3383_v3, %v4830_v57  ;;  %v1364_v7 = vpop.f32.mrb[19].mxu1  ;;  %v1532_v8 = vpop.f32.mrb[35].mxu0 }
 0x404   : > { %1624 = vst [vmem:[%s4841_s22] sm:$0xff] %v4837_v0  ;;  %v3023_v9 = vclamps-f32 %v1530_v1, 15.0  ;;  %v4852_v10 = vadd.f32 %v4825_v56, %v1364_v7  ;;  %v1533_v11 = vadd.f32 %v4830_v57, %v1532_v8 }
 0x405   : > { %1642 = vst [vmem:[%s4856_s18 + $0x10] sm:$0xff] %v3025_v4  ;;  %v1658_v12 = vmul.f32 0.5, %v3025_v4  ;;  %1627 = vst [vmem:[%s4841_s22 + $0x18] sm:$0xff] %v4846_v5  ;;  %v3026_v13 = vclamps-f32 %v1541_v6, 15.0 }
 0x406   : > { %1640 = vst [vmem:[%s4856_s18] sm:$0xff] %v3023_v9  ;;  %v1656_v14 = vmul.f32 0.5, %v3023_v9  ;;  %1625 = vst [vmem:[%s4841_s22 + $0x8] sm:$0xff] %v4852_v10  ;;  %v3024_v15 = vclamps-f32 %v1533_v11, 15.0 }
 0x407   : > { %v1676_v16 = vmul.f32 1.442695, %v1658_v12  ;;  %1643 = vst [vmem:[%s4856_s18 + $0x18] sm:$0xff] %v3026_v13  ;;  %v1659_v18 = vmul.f32 0.5, %v3026_v13  ;;  %v1710_v12 = vld [vmem:[%s4726_s17 + $0x30] sm:$0xff] }
 0x408   : > { %v1672_v19 = vmul.f32 1.442695, %v1656_v14  ;;  %1641 = vst [vmem:[%s4856_s18 + $0x8] sm:$0xff] %v3024_v15  ;;  %v1657_v20 = vmul.f32 0.5, %v3024_v15 }
 0x409   : > { %3697 = vpow2.f32 %v1676_v16  ;;  %v1678_v21 = vmul.f32 1.442695, %v1659_v18  ;;  %v1708_v18 = vld [vmem:[%s4726_s17 + $0x20] sm:$0xff] }
 0x40a   : > { %3699 = vpow2.f32 %v1672_v19  ;;  %v1674_v22 = vmul.f32 1.442695, %v1657_v20 }
 0x40b   : > { %3701 = vpow2.f32 %v1678_v21 }
 0x40c   : > { %3703 = vpow2.f32 %v1674_v22 }
 0x410   : > { %v3354_v23 = vpop.f32.mrb[20].mxu1  ;;  %v3386_v24 = vpop.f32.mrb[36].mxu0 }
 0x411   : > { %v4868_v26 = vadd.f32 %v3354_v23, %v4825_v56  ;;  %v1554_v27 = vadd.f32 %v3386_v24, %v4830_v57  ;;  %v1377_v28 = vpop.f32.mrb[21].mxu1  ;;  %v1545_v29 = vpop.f32.mrb[37].mxu0 }
 0x412   : > { %v4872_v30 = vadd.f32 %v4825_v56, %v1377_v28  ;;  %v1546_v31 = vadd.f32 %v4830_v57, %v1545_v29  ;;  %v3355_v32 = vpop.f32.mrb[22].mxu1  ;;  %v3387_v33 = vpop.f32.mrb[38].mxu0 }
 0x413   : > { %v3698_v35 = vpop.eup %3697  ;;  %1630 = vst [vmem:[%s4841_s22 + $0x30] sm:$0xff] %v4868_v26  ;;  %v3029_v37 = vclamps-f32 %v1554_v27, 15.0  ;;  %v4880_v38 = vadd.f32 %v3355_v32, %v4825_v56  ;;  %v1557_v39 = vadd.f32 %v3387_v33, %v4830_v57  ;;  %v1380_v40 = vpop.f32.mrb[23].mxu1  ;;  %v1709_v32 = vld [vmem:[%s4726_s17 + $0x28] sm:$0xff] }
 0x414   : > { %v1548_v41 = vpop.f32.mrb[39].mxu0  ;;  %v3700_v42 = vpop.eup %3699  ;;  %v1722_v43 = vmul.f32 %v3698_v35, %v1706_v25  ;;  %1628 = vst [vmem:[%s4841_s22 + $0x20] sm:$0xff] %v4872_v30  ;;  %v3027_v44 = vclamps-f32 %v1546_v31, 15.0  ;;  %v4886_v45 = vadd.f32 %v4825_v56, %v1380_v40  ;;  %v1711_v25 = vld [vmem:[%s4726_s17 + $0x38] sm:$0xff] }
 0x415   : > { %v1549_v46 = vadd.f32 %v4830_v57, %v1548_v41  ;;  %v3702_v48 = vpop.eup %3701  ;;  %1646 = vst [vmem:[%s4856_s18 + $0x30] sm:$0xff] %v3029_v37  ;;  %v1662_v49 = vmul.f32 0.5, %v3029_v37  ;;  %1631 = vst [vmem:[%s4841_s22 + $0x38] sm:$0xff] %v4880_v38  ;;  %v3030_v50 = vclamps-f32 %v1557_v39, 15.0  ;;  %v1720_v17 = vmul.f32 %v3700_v42, %v1704_v34 }
 0x416   : > { %v3704_v51 = vpop.eup %3703  ;;  %v1723_v52 = vmul.f32 %v3702_v48, %v1707_v36  ;;  %1644 = vst [vmem:[%s4856_s18 + $0x20] sm:$0xff] %v3027_v44  ;;  %v1660_v53 = vmul.f32 0.5, %v3027_v44  ;;  %1629 = vst [vmem:[%s4841_s22 + $0x28] sm:$0xff] %v4886_v45  ;;  %v1738_v55 = vadd.f32 %v1722_v43, %v4833_v60 }
 0x417   : > { %v3028_v54 = vclamps-f32 %v1549_v46, 15.0  ;;  %v1684_v58 = vmul.f32 1.442695, %v1662_v49  ;;  %1647 = vst [vmem:[%s4856_s18 + $0x38] sm:$0xff] %v3030_v50  ;;  %v1663_v59 = vmul.f32 0.5, %v3030_v50  ;;  %v1721_v61 = vmul.f32 %v3704_v51, %v1705_v47 }
 0x418   : > { %v1736_v62 = vadd.f32 %v1720_v17, %v4837_v0  ;;  %v1680_v63 = vmul.f32 1.442695, %v1660_v53  ;;  %v1739_v2 = vadd.f32 %v1723_v52, %v4846_v5 }
 0x419   : > { %1645 = vst [vmem:[%s4856_s18 + $0x28] sm:$0xff] %v3028_v54  ;;  %v1661_v1 = vmul.f32 0.5, %v3028_v54  ;;  %3705 = vpow2.f32 %v1684_v58  ;;  %v1686_v3 = vmul.f32 1.442695, %v1663_v59  ;;  %v1737_v4 = vadd.f32 %v1721_v61, %v4852_v10  ;;  %v1714_v61 = vld [vmem:[%s4726_s17 + $0x50] sm:$0xff] }
 0x41a   : > { %3707 = vpow2.f32 %v1680_v63  ;;  %v1753_v7 = vpack.c.bf16 %v1739_v2, %v1738_v55 }
 0x41b   : > { %v1682_v6 = vmul.f32 1.442695, %v1661_v1  ;;  %3709 = vpow2.f32 %v1686_v3  ;;  %v1752_v60 = vpack.c.bf16 %v1737_v4, %v1736_v62  ;;  %v1712_v3 = vld [vmem:[%s4726_s17 + $0x40] sm:$0xff] }
 0x41d   : > { %3711 = vpow2.f32 %v1682_v6  ;;  %3412 = vmatprep.mubr.bf16.mxu1 %v1752_v60 }
 0x41e   : > { %3413 = vmatmul.mubr.bf16.vlgmr.msra.gmra.mrb[32].mxu1 %v1753_v7 }
 0x420   : > { %v3358_v0 = vpop.f32.mrb[24].mxu1  ;;  %v3390_v8 = vpop.f32.mrb[40].mxu0 }
 0x421   : > { %v4903_v9 = vadd.f32 %v3358_v0, %v4825_v56  ;;  %v1570_v5 = vadd.f32 %v3390_v8, %v4830_v57  ;;  %v1393_v11 = vpop.f32.mrb[25].mxu1  ;;  %v1561_v10 = vpop.f32.mrb[41].mxu0 }
 0x422   : > { %v4908_v13 = vadd.f32 %v4825_v56, %v1393_v11  ;;  %v1562_v14 = vadd.f32 %v4830_v57, %v1561_v10  ;;  %v3359_v15 = vpop.f32.mrb[26].mxu1  ;;  %v3391_v16 = vpop.f32.mrb[42].mxu0 }
 0x423   : > { %v3706_v19 = vpop.eup %3705  ;;  %1634 = vst [vmem:[%s4841_s22 + $0x50] sm:$0xff] %v4903_v9  ;;  %v3033_v20 = vclamps-f32 %v1570_v5, 15.0  ;;  %v4915_v21 = vadd.f32 %v3359_v15, %v4825_v56  ;;  %v1573_v22 = vadd.f32 %v3391_v16, %v4830_v57  ;;  %v1396_v23 = vpop.f32.mrb[27].mxu1  ;;  %v1715_v5 = vld [vmem:[%s4726_s17 + $0x58] sm:$0xff]  ;;  %v1713_v15 = vld [vmem:[%s4726_s17 + $0x48] sm:$0xff] }
 0x424   : > { %v1564_v24 = vpop.f32.mrb[43].mxu0  ;;  %v3708_v27 = vpop.eup %3707  ;;  %1632 = vst [vmem:[%s4841_s22 + $0x40] sm:$0xff] %v4908_v13  ;;  %v3031_v28 = vclamps-f32 %v1562_v14, 15.0  ;;  %v4922_v29 = vadd.f32 %v4825_v56, %v1396_v23  ;;  %v1726_v33 = vmul.f32 %v3706_v19, %v1710_v12 }
 0x425   : > { %v1565_v31 = vadd.f32 %v4830_v57, %v1564_v24  ;;  %v3710_v34 = vpop.eup %3709  ;;  %1650 = vst [vmem:[%s4856_s18 + $0x50] sm:$0xff] %v3033_v20  ;;  %v1666_v35 = vmul.f32 0.5, %v3033_v20  ;;  %1635 = vst [vmem:[%s4841_s22 + $0x58] sm:$0xff] %v4915_v21  ;;  %v3034_v36 = vclamps-f32 %v1573_v22, 15.0  ;;  %v1724_v37 = vmul.f32 %v3708_v27, %v1708_v18 }
 0x426   : > { %1648 = vst [vmem:[%s4856_s18 + $0x40] sm:$0xff] %v3031_v28  ;;  %v1664_v40 = vmul.f32 0.5, %v3031_v28  ;;  %1633 = vst [vmem:[%s4841_s22 + $0x48] sm:$0xff] %v4922_v29  ;;  %v1727_v42 = vmul.f32 %v3710_v34, %v1711_v25  ;;  %v1742_v43 = vadd.f32 %v1726_v33, %v4868_v26 }
 0x427   : > { %v3712_v39 = vpop.eup %3711  ;;  %v3032_v41 = vclamps-f32 %v1565_v31, 15.0  ;;  %v1692_v44 = vmul.f32 1.442695, %v1666_v35  ;;  %1651 = vst [vmem:[%s4856_s18 + $0x58] sm:$0xff] %v3034_v36  ;;  %v1667_v46 = vmul.f32 0.5, %v3034_v36  ;;  %v1740_v48 = vadd.f32 %v1724_v37, %v4872_v30 }
 0x428   : > { %v1725_v47 = vmul.f32 %v3712_v39, %v1709_v32  ;;  %v1688_v49 = vmul.f32 1.442695, %v1664_v40  ;;  %v1743_v17 = vadd.f32 %v1727_v42, %v4880_v38 }
 0x429   : > { %1649 = vst [vmem:[%s4856_s18 + $0x48] sm:$0xff] %v3032_v41  ;;  %v1665_v50 = vmul.f32 0.5, %v3032_v41  ;;  %3713 = vpow2.f32 %v1692_v44  ;;  %v1694_v51 = vmul.f32 1.442695, %v1667_v46  ;;  %v1716_v41 = vld [vmem:[%s4726_s17 + $0x60] sm:$0xff]  ;;  %v1717_v46 = vld [vmem:[%s4726_s17 + $0x68] sm:$0xff] }
 0x42a   : > { %v1741_v52 = vadd.f32 %v1725_v47, %v4886_v45  ;;  %3715 = vpow2.f32 %v1688_v49  ;;  %v1755_v54 = vpack.c.bf16 %v1743_v17, %v1742_v43  ;;  %v1719_v43 = vld [vmem:[%s4726_s17 + $0x78] sm:$0xff] }
 0x42b   : > { %v1690_v53 = vmul.f32 1.442695, %v1665_v50  ;;  %3717 = vpow2.f32 %v1694_v51 }
 0x42c   : > { %v1754_v26 = vpack.c.bf16 %v1741_v52, %v1740_v48 }
 0x42d   : > { %3719 = vpow2.f32 %v1690_v53 }
 0x42e   : > { %3416 = vmatprep.mubr.bf16.mxu1 %v1754_v26 }
 0x42f   : > { %3417 = vmatmul.mubr.bf16.gmra.mrb[36].mxu1 %v1755_v54 }
 0x430   : > { %v3362_v30 = vpop.f32.mrb[28].mxu1  ;;  %v3394_v55 = vpop.f32.mrb[44].mxu0 }
 0x431   : > { %v4939_v58 = vadd.f32 %v3362_v30, %v4825_v56  ;;  %v1586_v38 = vadd.f32 %v3394_v55, %v4830_v57  ;;  %v1409_v59 = vpop.f32.mrb[29].mxu1  ;;  %v1577_v45 = vpop.f32.mrb[45].mxu0  ;;  %v3671_v30 = vld [vmem:[#allocation14 + $0x30] sm:$0xff]   ;;  %v3672_v55 = vld [vmem:[#allocation14 + $0x38] sm:$0xff]  }
 0x432   : > { %v4944_v62 = vadd.f32 %v4825_v56, %v1409_v59  ;;  %v1578_v63 = vadd.f32 %v4830_v57, %v1577_v45  ;;  %v3363_v1 = vpop.f32.mrb[30].mxu1  ;;  %v3395_v2 = vpop.f32.mrb[46].mxu0  ;;  %3440 = vmatprep.subr.bf16.mxu0 %v3671_v30  ;;  %v3673_v59 = vld [vmem:[#allocation16] ss:$8 sps:$4 sm:$0xff]   ;;  %v3678_v45 = vld [vmem:[#allocation16 + $0x14] ss:$8 sps:$4 sm:$0xff]  }
 0x433   : > { %v3714_v4 = vpop.eup %3713  ;;  %1638 = vst [vmem:[%s4841_s22 + $0x70] sm:$0xff] %v4939_v58  ;;  %v3037_v6 = vclamps-f32 %v1586_v38, 15.0  ;;  %v1421_v7 = vadd.f32 %v3363_v1, %v4825_v56  ;;  %v1589_v60 = vadd.f32 %v3395_v2, %v4830_v57  ;;  %v1412_v0 = vpop.f32.mrb[31].mxu1  ;;  %3441 = vmatpush3.bf16.msra.mxu0 %v3671_v30  ;;  %v3675_v38 = vld [vmem:[#allocation16 + $0x4] ss:$8 sps:$4 sm:$0xff]  }
 0x434   : > { %v1580_v8 = vpop.f32.mrb[47].mxu0  ;;  %v3716_v11 = vpop.eup %3715  ;;  %1636 = vst [vmem:[%s4841_s22 + $0x60] sm:$0xff] %v4944_v62  ;;  %v3035_v10 = vclamps-f32 %v1578_v63, 15.0  ;;  %v1413_v12 = vadd.f32 %v4825_v56, %v1412_v0  ;;  %v1730_v16 = vmul.f32 %v3714_v4, %v1714_v61  ;;  %3442 = vmatprep.subr.bf16.mxu0 %v3672_v55  ;;  %3460 = vmatprep.subr.bf16.mxu1 %v3675_v38  ;;  %v3681_v61 = vld [vmem:[#allocation16 + $0x24] ss:$8 sps:$4 sm:$0xff]  }
 0x435   : > { %v1581_v14 = vadd.f32 %v4830_v57, %v1580_v8  ;;  %v3718_v18 = vpop.eup %3717  ;;  %1654 = vst [vmem:[%s4856_s18 + $0x70] sm:$0xff] %v3037_v6  ;;  %v1670_v19 = vmul.f32 0.5, %v3037_v6  ;;  %1639 = vst [vmem:[%s4841_s22 + $0x78] sm:$0xff] %v1421_v7  ;;  %v3038_v20 = vclamps-f32 %v1589_v60, 15.0  ;;  %v1728_v22 = vmul.f32 %v3716_v11, %v1712_v3  ;;  %3468 = vmatpush1.bf16.msra.mxu1 %v3673_v59  ;;  %v3684_v63 = vld [vmem:[#allocation16 + $0x34] ss:$8 sps:$4 sm:$0xff]  }
 0x436   : > { %1652 = vst [vmem:[%s4856_s18 + $0x60] sm:$0xff] %v3035_v10  ;;  %v1668_v24 = vmul.f32 0.5, %v3035_v10  ;;  %1637 = vst [vmem:[%s4841_s22 + $0x68] sm:$0xff] %v1413_v12  ;;  %v1731_v27 = vmul.f32 %v3718_v18, %v1715_v5  ;;  %v1746_v56 = vadd.f32 %v1730_v16, %v4903_v9  ;;  %3461 = vmatprep.subr.bf16.mxu1 %v3678_v45  ;;  %v3682_v1 = vld [vmem:[#allocation16 + $0x30] ss:$8 sps:$4 sm:$0xff]   ;;  %s4117_s22 = sshll.u32 %s4277_s4, 4  ;;  %s4118_s22 = int_to_ptr.vmem [resolvable:$false] %s4117_s22 }
 0x437   : > { %v3720_v23 = vpop.eup %3719  ;;  %v3036_v25 = vclamps-f32 %v1581_v14, 15.0  ;;  %v1700_v28 = vmul.f32 1.442695, %v1670_v19  ;;  %1655 = vst [vmem:[%s4856_s18 + $0x78] sm:$0xff] %v3038_v20  ;;  %v1671_v57 = vmul.f32 0.5, %v3038_v20  ;;  %v1744_v32 = vadd.f32 %v1728_v22, %v4908_v13  ;;  %v1718_v13 = vld [vmem:[%s4726_s17 + $0x70] sm:$0xff]  ;;  %3443 = vmatpush3.bf16.msra.mxu0 %v3672_v55  ;;  %p4120_p4 = scmp.lt.s32.totalorder %s5016_s8, %s4118_s22 }
 0x438   : > { %v1729_v31 = vmul.f32 %v3720_v23, %v1713_v15  ;;  %v1696_v33 = vmul.f32 1.442695, %v1668_v24  ;;  %v1747_v35 = vadd.f32 %v1731_v27, %v4915_v21  ;;  %2252 = vmatprep.subr.bf16.mxu0 %v3675_v38  ;;  %v3687_v2 = vld [vmem:[#allocation16 + $0x44] ss:$8 sps:$4 sm:$0xff]   ;;  %v3685_v3 = vld [vmem:[#allocation16 + $0x40] ss:$8 sps:$4 sm:$0xff]  }
 0x439   : > { %1653 = vst [vmem:[%s4856_s18 + $0x68] sm:$0xff] %v3036_v25  ;;  %v1669_v34 = vmul.f32 0.5, %v3036_v25  ;;  %3721 = vpow2.f32 %v1700_v28  ;;  %v1702_v36 = vmul.f32 1.442695, %v1671_v57  ;;  %v3690_v4 = vld [vmem:[#allocation16 + $0x54] ss:$8 sps:$4 sm:$0xff]  }
 0x43a   : > { %v1745_v37 = vadd.f32 %v1729_v31, %v4922_v29  ;;  %3723 = vpow2.f32 %v1696_v33  ;;  %v1757_v39 = vpack.c.bf16 %v1747_v35, %v1746_v56  ;;  %v3688_v6 = vld [vmem:[#allocation16 + $0x50] ss:$8 sps:$4 sm:$0xff]   ;;  %s4119_s26 = scalar_lea.vmem %s4118_s22, 4096 }
 0x43b   : > { %v1698_v9 = vmul.f32 1.442695, %v1669_v34  ;;  %3725 = vpow2.f32 %v1702_v36  ;;  %p4121_p8 = scmp.lt.s32.totalorder %s4119_s26, %s4113_s16 }
 0x43c   : > { %v1756_v40 = vpack.c.bf16 %v1745_v37, %v1744_v32 }
 0x43d   : > { %3727 = vpow2.f32 %v1698_v9  ;;  %p4122_p11 = por %p4121_p8, %p4120_p4 }
 0x43e   : > { %3420 = vmatprep.mubr.bf16.mxu1 %v1756_v40 }
 0x43f   : > { %3421 = vmatmul.mubr.bf16.gmra.mrb[40].mxu1 %v1757_v39  ;;  %p4123_p3 = pnand %p4122_p11, %p4116_p9 }
 0x443   : > { %v3722_v42 = vpop.eup %3721 }
 0x444   : > { %v3724_v44 = vpop.eup %3723  ;;  %v1734_v21 = vmul.f32 %v3722_v42, %v1718_v13 }
 0x445   : > { %v3726_v47 = vpop.eup %3725  ;;  %v1732_v48 = vmul.f32 %v3724_v44, %v1716_v41 }
 0x446   : > { %v1735_v50 = vmul.f32 %v3726_v47, %v1719_v43  ;;  %v1750_v29 = vadd.f32 %v1734_v21, %v4939_v58  ;;  %v3676_v58 = vld [vmem:[#allocation16 + $0x10] ss:$8 sps:$4 sm:$0xff]  }
 0x447   : > { %v3728_v49 = vpop.eup %3727  ;;  %v1748_v51 = vadd.f32 %v1732_v48, %v4944_v62  ;;  %3469 = vmatpush1.bf16.msra.mxu1 %v3676_v58  ;;  %v3679_v62 = vld [vmem:[#allocation16 + $0x20] ss:$8 sps:$4 sm:$0xff]  }
 0x448   : > { %v1733_v17 = vmul.f32 %v3728_v49, %v1717_v46  ;;  %v1751_v52 = vadd.f32 %v1735_v50, %v1421_v7  ;;  %3462 = vmatprep.subr.bf16.mxu1 %v3681_v61  ;;  %v4977_v7 = vld [vmem:[%s5276_s20] ss:$0 sm:$0xff] }
 0x44a   : > { %v1749_v53 = vadd.f32 %v1733_v17, %v1413_v12  ;;  %v1759_v54 = vpack.c.bf16 %v1751_v52, %v1750_v29 }
 0x44b   : > { %3470 = vmatpush1.bf16.msra.mxu1 %v3679_v62 }
 0x44c   : > { %v1758_v26 = vpack.c.bf16 %v1749_v53, %v1748_v51  ;;  %3463 = vmatprep.subr.bf16.mxu1 %v3684_v63 }
 0x44e   : > { %3424 = vmatprep.mubr.bf16.mxu1 %v1758_v26 }
 0x44f   : > { %3425 = vmatmul.mubr.bf16.gmra.mrb[44].mxu1 %v1759_v54 }
 0x450   : > { %3471 = vmatpush1.bf16.msra.mxu1 %v3682_v1 }
 0x451   : > { %3464 = vmatprep.subr.bf16.mxu1 %v3687_v2 }
 0x454   : > { %3472 = vmatpush1.bf16.msra.mxu1 %v3685_v3 }
 0x455   : > { %3465 = vmatprep.subr.bf16.mxu1 %v3690_v4 }
 0x458   : > { %3473 = vmatpush1.bf16.msra.mxu1 %v3688_v6 }
 0x4f1   : > { %v3414_v60 = vpop.f32.mrb[32].mxu1 }
 0x4f2   : > { %v1874_v0 = vadd.f32 %v3414_v60, %v4977_v7  ;;  %v1865_v8 = vpop.f32.mrb[33].mxu1 }
 0x4f3   : > { %v1866_v5 = vadd.f32 %v4977_v7, %v1865_v8  ;;  %v3415_v11 = vpop.f32.mrb[34].mxu1 }
 0x4f4   : > { %v1877_v10 = vadd.f32 %v3415_v11, %v4977_v7  ;;  %v1868_v12 = vpop.f32.mrb[35].mxu1  ;;  %v1930_v15 = vmax.f32 %v1874_v0, 0.0 }
 0x4f5   : > { %v1869_v14 = vadd.f32 %v4977_v7, %v1868_v12  ;;  %v1928_v18 = vmax.f32 %v1866_v5, 0.0 }
 0x4f6   : > { %v1931_v16 = vmax.f32 %v1877_v10, 0.0 }
 0x4f7   : > { %v1929_v19 = vmax.f32 %v1869_v14, 0.0 }
 0x4f8   : > { %v1945_v20 = vpack.c.bf16 %v1931_v16, %v1930_v15 }
 0x4f9   : > { %v1944_v22 = vpack.c.bf16 %v1929_v19, %v1928_v18 }
 0x4fb   : > { %3444 = vmatprep.mubr.bf16.mxu0 %v1944_v22 }
 0x4fc   : > { %3445 = vmatmul.mubr.bf16.vlgmr.msra.gmra.mrb[48].mxu0 %v1945_v20 }
 0x4fd   : > { %2253 = vmatpush1.bf16.msra.mxu0 %v3673_v59 }
 0x4fe   : > { %2254 = vmatprep.subr.bf16.mxu0 %v3678_v45 }
 0x501   : > { %2255 = vmatpush1.bf16.msra.mxu0 %v3676_v58 }
 0x502   : > { %v3418_v23 = vpop.f32.mrb[36].mxu1  ;;  %2256 = vmatprep.subr.bf16.mxu0 %v3681_v61 }
 0x503   : > { %v1890_v24 = vadd.f32 %v3418_v23, %v4977_v7  ;;  %v1881_v25 = vpop.f32.mrb[37].mxu1 }
 0x504   : > { %v1882_v27 = vadd.f32 %v4977_v7, %v1881_v25  ;;  %v3419_v56 = vpop.f32.mrb[38].mxu1 }
 0x505   : > { %v1893_v28 = vadd.f32 %v3419_v56, %v4977_v7  ;;  %v1884_v57 = vpop.f32.mrb[39].mxu1  ;;  %2257 = vmatpush1.bf16.msra.mxu0 %v3679_v62  ;;  %v1934_v32 = vmax.f32 %v1890_v24, 0.0  ;;  %v3693_v62 = vld [vmem:[#allocation16 + $0x64] ss:$8 sps:$4 sm:$0xff]  }
 0x506   : > { %v1885_v31 = vadd.f32 %v4977_v7, %v1884_v57  ;;  %2258 = vmatprep.subr.bf16.mxu0 %v3684_v63  ;;  %v1932_v34 = vmax.f32 %v1882_v27, 0.0  ;;  %v3691_v63 = vld [vmem:[#allocation16 + $0x60] ss:$8 sps:$4 sm:$0xff]   ;;  %3466 = vmatprep.subr.bf16.mxu1 %v3693_v62 }
 0x507   : > { %v1935_v33 = vmax.f32 %v1893_v28, 0.0  ;;  %3474 = vmatpush1.bf16.msra.mxu1 %v3691_v63 }
 0x508   : > { %v1933_v35 = vmax.f32 %v1885_v31, 0.0 }
 0x509   : > { %v1947_v36 = vpack.c.bf16 %v1935_v33, %v1934_v32  ;;  %2259 = vmatpush1.bf16.msra.mxu0 %v3682_v1  ;;  %v3696_v1 = vld [vmem:[#allocation16 + $0x74] ss:$8 sps:$4 sm:$0xff]  }
 0x50a   : > { %v1946_v37 = vpack.c.bf16 %v1933_v35, %v1932_v34  ;;  %2260 = vmatprep.subr.bf16.mxu0 %v3687_v2  ;;  %v3694_v2 = vld [vmem:[#allocation16 + $0x70] ss:$8 sps:$4 sm:$0xff]   ;;  %3467 = vmatprep.subr.bf16.mxu1 %v3696_v1 }
 0x50b   : > { %3475 = vmatpush1.bf16.msra.mxu1 %v3694_v2 }
 0x50c   : > { %3448 = vmatprep.mubr.bf16.mxu0 %v1946_v37 }
 0x50d   : > { %3449 = vmatmul.mubr.bf16.gmra.mrb[52].mxu0 %v1947_v36 }
 0x50e   : > { %2261 = vmatpush1.bf16.msra.mxu0 %v3685_v3  ;;  %v4276_v3 = vmov 0  }
 0x50f   : > { %2262 = vmatprep.subr.bf16.mxu0 %v3690_v4  ;;  %2304 = vmatprep.mubr.bf16.mxu1 %v4276_v3  ;;  %v3048_v4 = vld [vmem:[%s5277_s11] ss:$0 sm:$0xff] }
 0x512   : > { %v3422_v9 = vpop.f32.mrb[40].mxu1  ;;  %2263 = vmatpush1.bf16.msra.mxu0 %v3688_v6 }
 0x513   : > { %v1906_v39 = vadd.f32 %v3422_v9, %v4977_v7  ;;  %v1897_v40 = vpop.f32.mrb[41].mxu1  ;;  %2264 = vmatprep.subr.bf16.mxu0 %v3693_v62 }
 0x514   : > { %v1898_v13 = vadd.f32 %v4977_v7, %v1897_v40  ;;  %v3423_v41 = vpop.f32.mrb[42].mxu1 }
 0x515   : > { %v1909_v42 = vadd.f32 %v3423_v41, %v4977_v7  ;;  %v1900_v43 = vpop.f32.mrb[43].mxu1  ;;  %v1938_v46 = vmax.f32 %v1906_v39, 0.0 }
 0x516   : > { %v1901_v44 = vadd.f32 %v4977_v7, %v1900_v43  ;;  %v1936_v47 = vmax.f32 %v1898_v13, 0.0  ;;  %2265 = vmatpush1.bf16.msra.mxu0 %v3691_v63 }
 0x517   : > { %v1939_v21 = vmax.f32 %v1909_v42, 0.0  ;;  %2266 = vmatprep.subr.bf16.mxu0 %v3696_v1 }
 0x518   : > { %v1937_v48 = vmax.f32 %v1901_v44, 0.0 }
 0x519   : > { %v1949_v49 = vpack.c.bf16 %v1939_v21, %v1938_v46 }
 0x51a   : > { %v1948_v50 = vpack.c.bf16 %v1937_v48, %v1936_v47  ;;  %2267 = vmatpush1.bf16.msra.mxu0 %v3694_v2 }
 0x51c   : > { %3452 = vmatprep.mubr.bf16.mxu0 %v1948_v50 }
 0x51d   : > { %3453 = vmatmul.mubr.bf16.gmra.mrb[56].mxu0 %v1949_v49 }
 0x522   : > { %v3426_v29 = vpop.f32.mrb[44].mxu1 }
 0x523   : > { %v1922_v17 = vadd.f32 %v3426_v29, %v4977_v7  ;;  %v1913_v51 = vpop.f32.mrb[45].mxu1 }
 0x524   : > { %v1914_v52 = vadd.f32 %v4977_v7, %v1913_v51  ;;  %v3427_v53 = vpop.f32.mrb[46].mxu1 }
 0x525   : > { %v1925_v54 = vadd.f32 %v3427_v53, %v4977_v7  ;;  %v1916_v26 = vpop.f32.mrb[47].mxu1  ;;  %v1942_v55 = vmax.f32 %v1922_v17, 0.0 }
 0x526   : > { %v1917_v30 = vadd.f32 %v4977_v7, %v1916_v26  ;;  %v1940_v59 = vmax.f32 %v1914_v52, 0.0 }
 0x527   : > { %v1943_v38 = vmax.f32 %v1925_v54, 0.0 }
 0x528   : > { %v1941_v45 = vmax.f32 %v1917_v30, 0.0 }
 0x529   : > { %v1951_v58 = vpack.c.bf16 %v1943_v38, %v1942_v55 }
 0x52a   : > { %v1950_v61 = vpack.c.bf16 %v1941_v45, %v1940_v59 }
 0x52c   : > { %3456 = vmatprep.mubr.bf16.mxu0 %v1950_v61 }
 0x52d   : > { %3457 = vmatmul.mubr.bf16.gmra.mrb[60].mxu0 %v1951_v58 }
 0x52e   : > { %2284 = vmatprep.mubr.bf16.mxu0 %v4276_v3 }
 0x5cf   : > { %v3446_v6 = vpop.f32.mrb[48].mxu0 }
 0x5d0   : > { %v2066_v7 = vadd.f32 %v3446_v6, %v3048_v4  ;;  %v2057_v60 = vpop.f32.mrb[49].mxu0 }
 0x5d1   : > { %v2058_v0 = vadd.f32 %v3048_v4, %v2057_v60  ;;  %v3447_v8 = vpop.f32.mrb[50].mxu0 }
 0x5d2   : > { %v2069_v5 = vadd.f32 %v3447_v8, %v3048_v4  ;;  %v2060_v11 = vpop.f32.mrb[51].mxu0  ;;  %v2122_v12 = vmax.f32 %v2066_v7, 0.0 }
 0x5d3   : > { %v2061_v10 = vadd.f32 %v3048_v4, %v2060_v11  ;;  %v2120_v15 = vmax.f32 %v2058_v0, 0.0 }
 0x5d4   : > { %v2123_v14 = vmax.f32 %v2069_v5, 0.0 }
 0x5d5   : > { %v2121_v16 = vmax.f32 %v2061_v10, 0.0 }
 0x5d6   : > { %v2137_v18 = vpack.c.bf16 %v2123_v14, %v2122_v12 }
 0x5d7   : > { %v2136_v19 = vpack.c.bf16 %v2121_v16, %v2120_v15 }
 0x5d9   : > { %2285 = vmatmul.mubr.bf16.vlgmr.msra.gmra.mrb[64].mxu0 %v2136_v19 }
 0x5da   : > { %2294 = vmatprep.mubr.bf16.mxu0 %v4276_v3 }
 0x5e0   : > { %v3450_v20 = vpop.f32.mrb[52].mxu0 }
 0x5e1   : > { %v2082_v22 = vadd.f32 %v3450_v20, %v3048_v4  ;;  %v2073_v23 = vpop.f32.mrb[53].mxu0  ;;  %2295 = vmatmul.mubr.bf16.gmra.mrb[68].mxu0 %v2137_v18 }
 0x5e2   : > { %v2074_v24 = vadd.f32 %v3048_v4, %v2073_v23  ;;  %v3451_v25 = vpop.f32.mrb[54].mxu0 }
 0x5e3   : > { %v2085_v27 = vadd.f32 %v3451_v25, %v3048_v4  ;;  %v2076_v56 = vpop.f32.mrb[55].mxu0  ;;  %v2126_v57 = vmax.f32 %v2082_v22, 0.0 }
 0x5e4   : > { %v2077_v28 = vadd.f32 %v3048_v4, %v2076_v56  ;;  %v2124_v32 = vmax.f32 %v2074_v24, 0.0 }
 0x5e5   : > { %v2127_v31 = vmax.f32 %v2085_v27, 0.0 }
 0x5e6   : > { %v2125_v33 = vmax.f32 %v2077_v28, 0.0 }
 0x5e7   : > { %v2139_v34 = vpack.c.bf16 %v2127_v31, %v2126_v57 }
 0x5e8   : > { %v2138_v35 = vpack.c.bf16 %v2125_v33, %v2124_v32 }
 0x5ea   : > { %2305 = vmatmul.mubr.bf16.vlgmr.msra.gmra.mrb[48].mxu1 %v2138_v35 }
 0x5eb   : > { %2314 = vmatprep.mubr.bf16.mxu1 %v4276_v3 }
 0x5f0   : > { %v3454_v36 = vpop.f32.mrb[56].mxu0 }
 0x5f1   : > { %v2098_v37 = vadd.f32 %v3454_v36, %v3048_v4  ;;  %v2089_v9 = vpop.f32.mrb[57].mxu0 }
 0x5f2   : > { %v2090_v39 = vadd.f32 %v3048_v4, %v2089_v9  ;;  %v3455_v40 = vpop.f32.mrb[58].mxu0  ;;  %2315 = vmatmul.mubr.bf16.gmra.mrb[52].mxu1 %v2139_v34 }
 0x5f3   : > { %v2101_v13 = vadd.f32 %v3455_v40, %v3048_v4  ;;  %v2092_v41 = vpop.f32.mrb[59].mxu0  ;;  %2324 = vmatprep.mubr.bf16.mxu1 %v4276_v3  ;;  %v2130_v43 = vmax.f32 %v2098_v37, 0.0 }
 0x5f4   : > { %v2093_v42 = vadd.f32 %v3048_v4, %v2092_v41  ;;  %v2128_v46 = vmax.f32 %v2090_v39, 0.0 }
 0x5f5   : > { %v2131_v44 = vmax.f32 %v2101_v13, 0.0 }
 0x5f6   : > { %v2129_v21 = vmax.f32 %v2093_v42, 0.0 }
 0x5f7   : > { %v2141_v47 = vpack.c.bf16 %v2131_v44, %v2130_v43 }
 0x5f8   : > { %v2140_v48 = vpack.c.bf16 %v2129_v21, %v2128_v46 }
 0x5fa   : > { %2325 = vmatmul.mubr.bf16.gmra.mrb[56].mxu1 %v2140_v48 }
 0x5fb   : > { %2334 = vmatprep.mubr.bf16.mxu1 %v4276_v3 }
 0x600   : > { %v3458_v49 = vpop.f32.mrb[60].mxu0 }
 0x601   : > { %v2114_v50 = vadd.f32 %v3458_v49, %v3048_v4  ;;  %v2105_v29 = vpop.f32.mrb[61].mxu0 }
 0x602   : > { %v2106_v17 = vadd.f32 %v3048_v4, %v2105_v29  ;;  %v3459_v51 = vpop.f32.mrb[62].mxu0  ;;  %2335 = vmatmul.mubr.bf16.gmra.mrb[60].mxu1 %v2141_v47 }
 0x603   : > { %v2117_v52 = vadd.f32 %v3459_v51, %v3048_v4  ;;  %v2108_v53 = vpop.f32.mrb[63].mxu0  ;;  %2344 = vmatprep.mubr.bf16.mxu1 %v4276_v3  ;;  %v2134_v26 = vmax.f32 %v2114_v50, 0.0 }
 0x604   : > { %v2109_v54 = vadd.f32 %v3048_v4, %v2108_v53  ;;  %v2132_v55 = vmax.f32 %v2106_v17, 0.0 }
 0x605   : > { %v2135_v30 = vmax.f32 %v2117_v52, 0.0 }
 0x606   : > { %v2133_v38 = vmax.f32 %v2109_v54, 0.0 }
 0x607   : > { %v2143_v59 = vpack.c.bf16 %v2135_v30, %v2134_v26 }
 0x608   : > { %v2142_v45 = vpack.c.bf16 %v2133_v38, %v2132_v55 }
 0x60a   : > { %2345 = vmatmul.mubr.bf16.gmra.mrb[64].mxu1 %v2142_v45 }
 0x60b   : > { %2354 = vmatprep.mubr.bf16.mxu1 %v4276_v3 }
 0x612   : > { %2355 = vmatmul.mubr.bf16.gmra.mrb[68].mxu1 %v2143_v59 }
 0x613   : > { %4126 = shalt.err (!%p4123_p3)
}
 0x614   : > { %s4127_s1 = scalar_lea.hbm %s5014_s19, 2048  ;;  %s4131_s17 = scalar_lea.hbm %s5278_s21, 4096 }
 0x615   : > { %p4128_p12 = scmp.ne.s32.totalorder %s5014_s19, %s4127_s1  ;;  %p4132_p0 = scmp.lt.u32.totalorder %s5014_s19, %s5278_s21 }
 0x616   : > { %p4133_p7 = scmp.lt.u32.totalorder %s4131_s17, %s4127_s1  ;;  %p4135_p6 = scmp.lt.u32.totalorder %s4127_s1, %s5014_s19 }
 0x617   : > { %p4129_p1 = pnand %p4128_p12, %p5279_p10 }
 0x618   : > { %p4134_p2 = por %p4133_p7, %p4132_p0 }
 0x619   : > { %p4130_p13 = pneg %p4129_p1 }
 0x61a   : > { %p4136_p5 = por %p4135_p6, %p4134_p2 }
 0x61c   : > { %p4137_p9 = pnand %p4136_p5, %p4130_p13 }
 0x61e   : > { %4140 = shalt.err (!%p4137_p9)
}
 0x61f   : > { %s4278_s7 = smov 128   ;;  %s4279_s9 = smov 8  }
 0x620   : > { %3509 = dma.vmem_to_hbm [thread:$0]  (%p5279_p10), %s5016_s8, 2048, %s5014_s19, %s5020_s0, %s4278_s7, %s4278_s7, %s4279_s9  }
 0x621   : > { %s5280_s22 = sld [smem:[#allocation45_spill]]  ;;  %s2726_s1 = sshll.u32 %s4856_s18, 4  ;;  %s5054_s1 = int_to_ptr.vmem [resolvable:$true] %s2726_s1 }
 0x622   : > { %s4141_s12 = scalar_lea.vmem %s5054_s1, 2048  ;;  %s4280_s20 = smov [#allocation20]  }
 0x623   : > { %p4142_p4 = scmp.ne.s32.totalorder %s5054_s1, %s4141_s12  ;;  %s4145_s17 = sshll.u32 %s4280_s20, 4  ;;  %s4146_s17 = int_to_ptr.vmem [resolvable:$false] %s4145_s17 }
 0x624   : > { %s4147_s8 = scalar_lea.vmem %s4146_s17, 4096  ;;  %p4148_p3 = scmp.lt.s32.totalorder %s5054_s1, %s4146_s17 }
 0x625   : > { %p4143_p8 = pnand %p4142_p4, %p5279_p10  ;;  %p4149_p12 = scmp.lt.s32.totalorder %s4147_s8, %s4141_s12 }
 0x627   : > { %s5051_s26 = scalar_lea.hbm %s5280_s22, %s5007_s6  ;;  %p4144_p11 = pneg %p4143_p8 }
 0x628   : > { %p4150_p1 = por %p4149_p12, %p4148_p3 }
 0x62a   : > { %p4151_p13 = pnand %p4150_p1, %p4144_p11 }
 0x62c   : > { %4154 = shalt.err (!%p4151_p13)
}
 0x62d   : > { %s4155_s18 = scalar_lea.hbm %s5051_s26, 2048  ;;  %s4159_s11 = scalar_lea.hbm %s5280_s22, 4096 }
 0x62e   : > { %p4156_p0 = scmp.ne.s32.totalorder %s5051_s26, %s4155_s18  ;;  %p4160_p6 = scmp.lt.u32.totalorder %s5051_s26, %s5280_s22 }
 0x62f   : > { %p4161_p5 = scmp.lt.u32.totalorder %s4159_s11, %s4155_s18  ;;  %p4163_p4 = scmp.lt.u32.totalorder %s4155_s18, %s5051_s26 }
 0x630   : > { %p4157_p7 = pnand %p4156_p0, %p5279_p10 }
 0x631   : > { %p4162_p9 = por %p4161_p5, %p4160_p6 }
 0x632   : > { %p4158_p2 = pneg %p4157_p7 }
 0x633   : > { %p4164_p8 = por %p4163_p4, %p4162_p9 }
 0x635   : > { %p4165_p11 = pnand %p4164_p8, %p4158_p2 }
 0x637   : > { %4168 = shalt.err (!%p4165_p11)
}
 0x638   : > { %3510 = dma.vmem_to_hbm [thread:$0]  (%p5279_p10), %s5054_s1, 2048, %s5051_s26, %s5020_s0, %s4278_s7, %s4278_s7, %s4279_s9   ;;  %v2162_v58 = vlaneseq }
 0x639   : > { %s5281_s17 = sld [smem:[#allocation42_spill]]  ;;  %s5105_s0 = scalar_lea.vmem [#allocation17], %s4721_s14 }
 0x63a   : > { %v2163_v61 = vshrl.u32 %v2162_v58, 7  ;;  %s2694_s14 = sshll.u32 %s5105_s0, 4  ;;  %s5282_s8 = sld [smem:[#allocation43_spill]]  ;;  %s5145_s14 = int_to_ptr.vmem [resolvable:$true] %s2694_s14 }
 0x63b   : > { %s2670_s19 = scalar_lea.sflag [#allocation4], %s4709_s15  ;;  %s4169_s25 = scalar_lea.vmem %s5145_s14, 2048 }
 0x63c   : > { %v2164_v62 = vsub.s32 0, %v2163_v61  ;;  %v2168_v1 = vsub.s32 1, %v2163_v61  ;;  %p4170_p3 = scmp.ne.s32.totalorder %s5145_s14, %s4169_s25  ;;  %s4281_s11 = smov [#allocation17]  }
 0x63d   : > { %s4173_s16 = sshll.u32 %s4281_s11, 4  ;;  %s4174_s16 = int_to_ptr.vmem [resolvable:$false] %s4173_s16 }
 0x63e   : > { %p4171_p12 = pnand %p4170_p3, %p5279_p10  ;;  %s4175_s4 = scalar_lea.vmem %s4174_s16, 4096 }
 0x63f   : > { %v2160_v63 = vld [vmem:[%s5281_s17] sm:$0x3]  ;;  %p4176_p13 = scmp.lt.s32.totalorder %s5145_s14, %s4174_s16  ;;  %p4177_p0 = scmp.lt.s32.totalorder %s4175_s4, %s4169_s25 }
 0x640   : > { %v5084_v2 = vrot.slane %v2160_v63, %v2164_v62  ;;  %v5086_v3 = vrot.slane %v2160_v63, %v2168_v1  ;;  %s5143_s18 = scalar_lea.hbm %s5282_s8, %s5007_s6  ;;  %p4172_p1 = pneg %p4171_p12 }
 0x641   : > { %p4178_p7 = por %p4177_p0, %p4176_p13 }
 0x643   : > { %p4179_p2 = pnand %p4178_p7, %p4172_p1 }
 0x6ac   : > { %v2286_v4 = vpop.f32.mrb[64].mxu0 }
 0x6ad   : > { %v2287_v6 = vadd.f32 %v2286_v4, %v5084_v2  ;;  %v2288_v7 = vpop.f32.mrb[65].mxu0 }
 0x6ae   : > { %v2289_v60 = vadd.f32 %v2288_v7, %v5086_v3  ;;  %v2290_v0 = vpop.f32.mrb[66].mxu0 }
 0x6af   : > { %v3073_v8 = vmul.f32 -1.442695, %v2287_v6  ;;  %v2291_v5 = vadd.f32 %v2290_v0, %v5084_v2  ;;  %v2292_v11 = vpop.f32.mrb[67].mxu0 }
 0x6b0   : > { %v3074_v10 = vmul.f32 -1.442695, %v2289_v60  ;;  %v2293_v12 = vadd.f32 %v2292_v11, %v5086_v3 }
 0x6b1   : > { %3729 = vpow2.f32 %v3073_v8  ;;  %v3075_v14 = vmul.f32 -1.442695, %v2291_v5 }
 0x6b2   : > { %3731 = vpow2.f32 %v3074_v10  ;;  %v3076_v15 = vmul.f32 -1.442695, %v2293_v12 }
 0x6b3   : > { %3733 = vpow2.f32 %v3075_v14 }
 0x6b4   : > { %3735 = vpow2.f32 %v3076_v15  ;;  %v2296_v16 = vpop.f32.mrb[68].mxu0 }
 0x6b5   : > { %v2297_v18 = vadd.f32 %v2296_v16, %v5084_v2  ;;  %v2298_v19 = vpop.f32.mrb[69].mxu0 }
 0x6b6   : > { %v2299_v20 = vadd.f32 %v2298_v19, %v5086_v3  ;;  %v2300_v22 = vpop.f32.mrb[70].mxu0 }
 0x6b7   : > { %v3077_v23 = vmul.f32 -1.442695, %v2297_v18  ;;  %v2301_v24 = vadd.f32 %v2300_v22, %v5084_v2  ;;  %v2302_v25 = vpop.f32.mrb[71].mxu0 }
 0x6b8   : > { %v3078_v27 = vmul.f32 -1.442695, %v2299_v20  ;;  %v2303_v56 = vadd.f32 %v2302_v25, %v5086_v3 }
 0x6b9   : > { %3737 = vpow2.f32 %v3077_v23  ;;  %v3079_v28 = vmul.f32 -1.442695, %v2301_v24 }
 0x6ba   : > { %3739 = vpow2.f32 %v3078_v27  ;;  %v3080_v57 = vmul.f32 -1.442695, %v2303_v56 }
 0x6bb   : > { %v3730_v31 = vpop.eup %3729  ;;  %3741 = vpow2.f32 %v3079_v28 }
 0x6bc   : > { %v3732_v32 = vpop.eup %3731  ;;  %v2461_v33 = vadd.f32 1.0, %v3730_v31  ;;  %3743 = vpow2.f32 %v3080_v57 }
 0x6bd   : > { %v2306_v34 = vpop.f32.mrb[48].mxu1  ;;  %v3734_v35 = vpop.eup %3733  ;;  %v2462_v36 = vadd.f32 1.0, %v3732_v32 }
 0x6be   : > { %v2307_v37 = vadd.f32 %v2306_v34, %v5084_v2  ;;  %v2308_v9 = vpop.f32.mrb[49].mxu1  ;;  %v3736_v39 = vpop.eup %3735  ;;  %3745 = vrcp.f32 %v2461_v33  ;;  %v2463_v40 = vadd.f32 1.0, %v3734_v35 }
 0x6bf   : > { %v2309_v13 = vadd.f32 %v2308_v9, %v5086_v3  ;;  %v2310_v41 = vpop.f32.mrb[50].mxu1  ;;  %3747 = vrcp.f32 %v2462_v36  ;;  %v2464_v42 = vadd.f32 1.0, %v3736_v39 }
 0x6c0   : > { %v3081_v43 = vmul.f32 -1.442695, %v2307_v37  ;;  %v2311_v44 = vadd.f32 %v2310_v41, %v5084_v2  ;;  %v2312_v46 = vpop.f32.mrb[51].mxu1  ;;  %3749 = vrcp.f32 %v2463_v40 }
 0x6c1   : > { %v3082_v21 = vmul.f32 -1.442695, %v2309_v13  ;;  %v2313_v47 = vadd.f32 %v2312_v46, %v5086_v3  ;;  %3751 = vrcp.f32 %v2464_v42 }
 0x6c2   : > { %v3083_v48 = vmul.f32 -1.442695, %v2311_v44  ;;  %3753 = vpow2.f32 %v3081_v43 }
 0x6c3   : > { %v3084_v49 = vmul.f32 -1.442695, %v2313_v47  ;;  %v3738_v50 = vpop.eup %3737  ;;  %3755 = vpow2.f32 %v3082_v21 }
 0x6c4   : > { %v3740_v29 = vpop.eup %3739  ;;  %v2465_v17 = vadd.f32 1.0, %v3738_v50  ;;  %3757 = vpow2.f32 %v3083_v48 }
 0x6c5   : > { %v2316_v51 = vpop.f32.mrb[52].mxu1  ;;  %v3742_v52 = vpop.eup %3741  ;;  %v2466_v53 = vadd.f32 1.0, %v3740_v29  ;;  %3759 = vpow2.f32 %v3084_v49 }
 0x6c6   : > { %v2317_v54 = vadd.f32 %v2316_v51, %v5084_v2  ;;  %v2318_v26 = vpop.f32.mrb[53].mxu1  ;;  %v3744_v30 = vpop.eup %3743  ;;  %3761 = vrcp.f32 %v2465_v17  ;;  %v2467_v55 = vadd.f32 1.0, %v3742_v52 }
 0x6c7   : > { %v2319_v38 = vadd.f32 %v2318_v26, %v5086_v3  ;;  %v2320_v59 = vpop.f32.mrb[54].mxu1  ;;  %3763 = vrcp.f32 %v2466_v53  ;;  %v2468_v45 = vadd.f32 1.0, %v3744_v30 }
 0x6c8   : > { %v3085_v58 = vmul.f32 -1.442695, %v2317_v54  ;;  %v2321_v61 = vadd.f32 %v2320_v59, %v5084_v2  ;;  %v2322_v62 = vpop.f32.mrb[55].mxu1  ;;  %v3746_v63 = vpop.eup %3745  ;;  %3765 = vrcp.f32 %v2467_v55 }
 0x6c9   : > { %v3086_v1 = vmul.f32 -1.442695, %v2319_v38  ;;  %v2323_v4 = vadd.f32 %v2322_v62, %v5086_v3  ;;  %v3748_v6 = vpop.eup %3747  ;;  %3767 = vrcp.f32 %v2468_v45 }
 0x6ca   : > { %v3087_v7 = vmul.f32 -1.442695, %v2321_v61  ;;  %v3750_v60 = vpop.eup %3749  ;;  %v3136_v0 = vpack.c.bf16 %v3748_v6, %v3746_v63  ;;  %3769 = vpow2.f32 %v3085_v58 }
 0x6cb   : > { %v3088_v8 = vmul.f32 -1.442695, %v2323_v4  ;;  %v3752_v5 = vpop.eup %3751  ;;  %3771 = vpow2.f32 %v3086_v1 }
 0x6cc   : > { %v3754_v11 = vpop.eup %3753  ;;  %2653 = vst [vmem:[%s5105_s0] sm:$0xff] %v3136_v0  ;;  %v3137_v10 = vpack.c.bf16 %v3752_v5, %v3750_v60  ;;  %3773 = vpow2.f32 %v3087_v7 }
 0x6cd   : > { %v2326_v12 = vpop.f32.mrb[56].mxu1  ;;  %v3756_v14 = vpop.eup %3755  ;;  %v2469_v15 = vadd.f32 1.0, %v3754_v11  ;;  %3775 = vpow2.f32 %v3088_v8 }
 0x6ce   : > { %v2327_v16 = vadd.f32 %v2326_v12, %v5084_v2  ;;  %v2328_v18 = vpop.f32.mrb[57].mxu1  ;;  %v3758_v19 = vpop.eup %3757  ;;  %2654 = vst [vmem:[%s5105_s0 + $0x8] sm:$0xff] %v3137_v10  ;;  %v2470_v20 = vadd.f32 1.0, %v3756_v14 }
 0x6cf   : > { %v2329_v22 = vadd.f32 %v2328_v18, %v5086_v3  ;;  %v2330_v23 = vpop.f32.mrb[58].mxu1  ;;  %v3760_v24 = vpop.eup %3759  ;;  %3777 = vrcp.f32 %v2469_v15  ;;  %v2471_v25 = vadd.f32 1.0, %v3758_v19 }
 0x6d0   : > { %v3089_v27 = vmul.f32 -1.442695, %v2327_v16  ;;  %v2331_v56 = vadd.f32 %v2330_v23, %v5084_v2  ;;  %v2332_v28 = vpop.f32.mrb[59].mxu1  ;;  %v3762_v57 = vpop.eup %3761  ;;  %3779 = vrcp.f32 %v2470_v20  ;;  %v2472_v31 = vadd.f32 1.0, %v3760_v24 }
 0x6d1   : > { %v3090_v32 = vmul.f32 -1.442695, %v2329_v22  ;;  %v2333_v33 = vadd.f32 %v2332_v28, %v5086_v3  ;;  %v3764_v34 = vpop.eup %3763  ;;  %3781 = vrcp.f32 %v2471_v25 }
 0x6d2   : > { %v3091_v35 = vmul.f32 -1.442695, %v2331_v56  ;;  %v3766_v36 = vpop.eup %3765  ;;  %v3138_v37 = vpack.c.bf16 %v3764_v34, %v3762_v57  ;;  %3783 = vrcp.f32 %v2472_v31 }
 0x6d3   : > { %v3092_v9 = vmul.f32 -1.442695, %v2333_v33  ;;  %v3768_v39 = vpop.eup %3767  ;;  %3785 = vpow2.f32 %v3089_v27 }
 0x6d4   : > { %v3770_v40 = vpop.eup %3769  ;;  %2655 = vst [vmem:[%s5105_s0 + $0x10] sm:$0xff] %v3138_v37  ;;  %v3139_v13 = vpack.c.bf16 %v3768_v39, %v3766_v36  ;;  %3787 = vpow2.f32 %v3090_v32 }
 0x6d5   : > { %v2336_v41 = vpop.f32.mrb[60].mxu1  ;;  %v3772_v42 = vpop.eup %3771  ;;  %v2473_v43 = vadd.f32 1.0, %v3770_v40  ;;  %3789 = vpow2.f32 %v3091_v35 }
 0x6d6   : > { %v2337_v44 = vadd.f32 %v2336_v41, %v5084_v2  ;;  %v2338_v46 = vpop.f32.mrb[61].mxu1  ;;  %v3774_v21 = vpop.eup %3773  ;;  %2656 = vst [vmem:[%s5105_s0 + $0x18] sm:$0xff] %v3139_v13  ;;  %v2474_v47 = vadd.f32 1.0, %v3772_v42  ;;  %3791 = vpow2.f32 %v3092_v9 }
 0x6d7   : > { %v2339_v48 = vadd.f32 %v2338_v46, %v5086_v3  ;;  %v2340_v49 = vpop.f32.mrb[62].mxu1  ;;  %v3776_v50 = vpop.eup %3775  ;;  %3793 = vrcp.f32 %v2473_v43  ;;  %v2475_v29 = vadd.f32 1.0, %v3774_v21 }
 0x6d8   : > { %v3093_v17 = vmul.f32 -1.442695, %v2337_v44  ;;  %v2341_v51 = vadd.f32 %v2340_v49, %v5084_v2  ;;  %v2342_v52 = vpop.f32.mrb[63].mxu1  ;;  %3795 = vrcp.f32 %v2474_v47  ;;  %v2476_v53 = vadd.f32 1.0, %v3776_v50 }
 0x6d9   : > { %v3094_v54 = vmul.f32 -1.442695, %v2339_v48  ;;  %v2343_v26 = vadd.f32 %v2342_v52, %v5086_v3  ;;  %v3778_v30 = vpop.eup %3777  ;;  %3797 = vrcp.f32 %v2475_v29 }
 0x6da   : > { %v3095_v55 = vmul.f32 -1.442695, %v2341_v51  ;;  %v3780_v38 = vpop.eup %3779  ;;  %3799 = vrcp.f32 %v2476_v53 }
 0x6db   : > { %v3096_v59 = vmul.f32 -1.442695, %v2343_v26  ;;  %v3782_v45 = vpop.eup %3781  ;;  %v3140_v58 = vpack.c.bf16 %v3780_v38, %v3778_v30  ;;  %3801 = vpow2.f32 %v3093_v17 }
 0x6dc   : > { %v3784_v61 = vpop.eup %3783  ;;  %3803 = vpow2.f32 %v3094_v54 }
 0x6dd   : > { %v2346_v62 = vpop.f32.mrb[64].mxu1  ;;  %v3786_v63 = vpop.eup %3785  ;;  %2657 = vst [vmem:[%s5105_s0 + $0x20] sm:$0xff] %v3140_v58  ;;  %v3141_v1 = vpack.c.bf16 %v3784_v61, %v3782_v45  ;;  %3805 = vpow2.f32 %v3095_v55 }
 0x6de   : > { %v2347_v4 = vadd.f32 %v2346_v62, %v5084_v2  ;;  %v2348_v6 = vpop.f32.mrb[65].mxu1  ;;  %v3788_v7 = vpop.eup %3787  ;;  %v2477_v60 = vadd.f32 1.0, %v3786_v63  ;;  %3807 = vpow2.f32 %v3096_v59 }
 0x6df   : > { %v2349_v0 = vadd.f32 %v2348_v6, %v5086_v3  ;;  %v2350_v8 = vpop.f32.mrb[66].mxu1  ;;  %v3790_v5 = vpop.eup %3789  ;;  %2658 = vst [vmem:[%s5105_s0 + $0x28] sm:$0xff] %v3141_v1  ;;  %v2478_v11 = vadd.f32 1.0, %v3788_v7 }
 0x6e0   : > { %v2351_v10 = vadd.f32 %v2350_v8, %v5084_v2  ;;  %v2352_v12 = vpop.f32.mrb[67].mxu1  ;;  %v3792_v14 = vpop.eup %3791  ;;  %3809 = vrcp.f32 %v2477_v60  ;;  %v2479_v15 = vadd.f32 1.0, %v3790_v5  ;;  %v3097_v16 = vmul.f32 -1.442695, %v2347_v4 }
 0x6e1   : > { %v2353_v18 = vadd.f32 %v2352_v12, %v5086_v3  ;;  %v3794_v19 = vpop.eup %3793  ;;  %3811 = vrcp.f32 %v2478_v11  ;;  %v2480_v20 = vadd.f32 1.0, %v3792_v14  ;;  %v3098_v22 = vmul.f32 -1.442695, %v2349_v0 }
 0x6e2   : > { %v3796_v23 = vpop.eup %3795  ;;  %3813 = vrcp.f32 %v2479_v15  ;;  %v3099_v24 = vmul.f32 -1.442695, %v2351_v10 }
 0x6e3   : > { %v3798_v25 = vpop.eup %3797  ;;  %v3142_v27 = vpack.c.bf16 %v3796_v23, %v3794_v19  ;;  %3815 = vrcp.f32 %v2480_v20  ;;  %v3100_v56 = vmul.f32 -1.442695, %v2353_v18 }
 0x6e4   : > { %v3800_v28 = vpop.eup %3799  ;;  %3817 = vpow2.f32 %v3097_v16 }
 0x6e5   : > { %v2356_v57 = vpop.f32.mrb[68].mxu1  ;;  %v3802_v31 = vpop.eup %3801  ;;  %2659 = vst [vmem:[%s5105_s0 + $0x30] sm:$0xff] %v3142_v27  ;;  %v3143_v32 = vpack.c.bf16 %v3800_v28, %v3798_v25  ;;  %3819 = vpow2.f32 %v3098_v22 }
 0x6e6   : > { %v2357_v33 = vadd.f32 %v2356_v57, %v5084_v2  ;;  %v2358_v34 = vpop.f32.mrb[69].mxu1  ;;  %v3804_v35 = vpop.eup %3803  ;;  %v2481_v36 = vadd.f32 1.0, %v3802_v31  ;;  %3821 = vpow2.f32 %v3099_v24 }
 0x6e7   : > { %v2359_v37 = vadd.f32 %v2358_v34, %v5086_v3  ;;  %v2360_v9 = vpop.f32.mrb[70].mxu1  ;;  %v3806_v39 = vpop.eup %3805  ;;  %2660 = vst [vmem:[%s5105_s0 + $0x38] sm:$0xff] %v3143_v32  ;;  %v2482_v40 = vadd.f32 1.0, %v3804_v35  ;;  %3823 = vpow2.f32 %v3100_v56 }
 0x6e8   : > { %v2361_v13 = vadd.f32 %v2360_v9, %v5084_v2  ;;  %v2362_v41 = vpop.f32.mrb[71].mxu1  ;;  %v3808_v42 = vpop.eup %3807  ;;  %3825 = vrcp.f32 %v2481_v36  ;;  %v2483_v43 = vadd.f32 1.0, %v3806_v39  ;;  %v3101_v44 = vmul.f32 -1.442695, %v2357_v33 }
 0x6e9   : > { %v2363_v46 = vadd.f32 %v2362_v41, %v5086_v3  ;;  %3827 = vrcp.f32 %v2482_v40  ;;  %v2484_v21 = vadd.f32 1.0, %v3808_v42  ;;  %v3102_v47 = vmul.f32 -1.442695, %v2359_v37 }
 0x6ea   : > { %v3810_v48 = vpop.eup %3809  ;;  %3829 = vrcp.f32 %v2483_v43  ;;  %v3103_v49 = vmul.f32 -1.442695, %v2361_v13 }
 0x6eb   : > { %v3812_v50 = vpop.eup %3811  ;;  %3831 = vrcp.f32 %v2484_v21  ;;  %v3104_v29 = vmul.f32 -1.442695, %v2363_v46 }
 0x6ec   : > { %v3814_v17 = vpop.eup %3813  ;;  %v3144_v2 = vpack.c.bf16 %v3812_v50, %v3810_v48  ;;  %3833 = vpow2.f32 %v3101_v44 }
 0x6ed   : > { %v3816_v51 = vpop.eup %3815  ;;  %3835 = vpow2.f32 %v3102_v47 }
 0x6ee   : > { %v3818_v52 = vpop.eup %3817  ;;  %2661 = vst [vmem:[%s5105_s0 + $0x40] sm:$0xff] %v3144_v2  ;;  %v3145_v53 = vpack.c.bf16 %v3816_v51, %v3814_v17  ;;  %3837 = vpow2.f32 %v3103_v49 }
 0x6ef   : > { %v3820_v3 = vpop.eup %3819  ;;  %v2485_v54 = vadd.f32 1.0, %v3818_v52  ;;  %3839 = vpow2.f32 %v3104_v29 }
 0x6f0   : > { %v3822_v26 = vpop.eup %3821  ;;  %2662 = vst [vmem:[%s5105_s0 + $0x48] sm:$0xff] %v3145_v53  ;;  %v2486_v30 = vadd.f32 1.0, %v3820_v3 }
 0x6f1   : > { %v3824_v55 = vpop.eup %3823  ;;  %3841 = vrcp.f32 %v2485_v54  ;;  %v2487_v38 = vadd.f32 1.0, %v3822_v26 }
 0x6f2   : > { %v3826_v59 = vpop.eup %3825  ;;  %3843 = vrcp.f32 %v2486_v30  ;;  %v2488_v45 = vadd.f32 1.0, %v3824_v55 }
 0x6f3   : > { %v3828_v58 = vpop.eup %3827  ;;  %3845 = vrcp.f32 %v2487_v38 }
 0x6f4   : > { %v3830_v61 = vpop.eup %3829  ;;  %v3146_v62 = vpack.c.bf16 %v3828_v58, %v3826_v59  ;;  %3847 = vrcp.f32 %v2488_v45 }
 0x6f5   : > { %v3832_v63 = vpop.eup %3831 }
 0x6f6   : > { %v3834_v1 = vpop.eup %3833  ;;  %2663 = vst [vmem:[%s5105_s0 + $0x50] sm:$0xff] %v3146_v62  ;;  %v3147_v4 = vpack.c.bf16 %v3832_v63, %v3830_v61 }
 0x6f7   : > { %v3836_v6 = vpop.eup %3835  ;;  %v2489_v7 = vadd.f32 1.0, %v3834_v1 }
 0x6f8   : > { %v3838_v60 = vpop.eup %3837  ;;  %2664 = vst [vmem:[%s5105_s0 + $0x58] sm:$0xff] %v3147_v4  ;;  %v2490_v0 = vadd.f32 1.0, %v3836_v6 }
 0x6f9   : > { %v3840_v8 = vpop.eup %3839  ;;  %3849 = vrcp.f32 %v2489_v7  ;;  %v2491_v5 = vadd.f32 1.0, %v3838_v60 }
 0x6fa   : > { %3851 = vrcp.f32 %v2490_v0  ;;  %v2492_v11 = vadd.f32 1.0, %v3840_v8 }
 0x6fb   : > { %v3842_v10 = vpop.eup %3841  ;;  %3853 = vrcp.f32 %v2491_v5 }
 0x6fc   : > { %v3844_v12 = vpop.eup %3843  ;;  %3855 = vrcp.f32 %v2492_v11 }
 0x6fd   : > { %v3846_v14 = vpop.eup %3845  ;;  %v3148_v15 = vpack.c.bf16 %v3844_v12, %v3842_v10 }
 0x6fe   : > { %v3848_v16 = vpop.eup %3847 }
 0x6ff   : > { %2665 = vst [vmem:[%s5105_s0 + $0x60] sm:$0xff] %v3148_v15  ;;  %v3149_v18 = vpack.c.bf16 %v3848_v16, %v3846_v14 }
 0x701   : > { %2666 = vst [vmem:[%s5105_s0 + $0x68] sm:$0xff] %v3149_v18 }
 0x703   : > { %v3850_v19 = vpop.eup %3849 }
 0x704   : > { %v3852_v20 = vpop.eup %3851 }
 0x705   : > { %v3854_v22 = vpop.eup %3853  ;;  %v3150_v23 = vpack.c.bf16 %v3852_v20, %v3850_v19 }
 0x706   : > { %v3856_v24 = vpop.eup %3855 }
 0x707   : > { %2667 = vst [vmem:[%s5105_s0 + $0x70] sm:$0xff] %v3150_v23  ;;  %v3151_v25 = vpack.c.bf16 %v3856_v24, %v3854_v22 }
 0x709   : > { %2668 = vst [vmem:[%s5105_s0 + $0x78] sm:$0xff] %v3151_v25 }
 0x70a   : > { %4182 = shalt.err (!%p4179_p2)
}
 0x70b   : > { %s4183_s6 = scalar_lea.hbm %s5143_s18, 2048  ;;  %s4187_s17 = scalar_lea.hbm %s5282_s8, 4096 }
 0x70c   : > { %p4184_p6 = scmp.ne.s32.totalorder %s5143_s18, %s4183_s6  ;;  %p4188_p4 = scmp.lt.u32.totalorder %s5143_s18, %s5282_s8 }
 0x70d   : > { %p4189_p8 = scmp.lt.u32.totalorder %s4187_s17, %s4183_s6  ;;  %p4191_p3 = scmp.lt.u32.totalorder %s4183_s6, %s5143_s18 }
 0x70e   : > { %p4185_p5 = pnand %p4184_p6, %p5279_p10 }
 0x70f   : > { %p4190_p11 = por %p4189_p8, %p4188_p4 }
 0x710   : > { %p4186_p9 = pneg %p4185_p5 }
 0x711   : > { %p4192_p12 = por %p4191_p3, %p4190_p11 }
 0x713   : > { %p4193_p1 = pnand %p4192_p12, %p4186_p9 }
 0x715   : > { %4196 = shalt.err (!%p4193_p1)
}
 0x716   : > { %3508 = dma.vmem_to_hbm [thread:$0]  (%p5279_p10), %s5145_s14, 2048, %s5143_s18, %s2670_s19, %s4278_s7, %s4278_s7, %s4279_s9  }
 0x717 PF: > { %s2741_s1 = sand.u32 1, %s4247_s27   ;;  %p5283_p13 = scmp.ne.s32.totalorder %s5258_s23, 0 }
 0x718   : > { %p5284_p0 = scmp.ge.s32.totalorder %s4259_s30, 2  ;;  %s2742_s25 = scalar_lea.sflag [#allocation4], %s2741_s1 }
 0x71a   : > { %p3544_p7 = pnand %p5284_p0, %p5283_p13 }
 0x71c   : > { %4238 = dma.done.wait (!%p3544_p7), %s2742_s25, 2048  }
 0x71d   : > { %4240 = vsyncadd (!%p3544_p7), %s2742_s25, 4294965248  ;;  %s5285_s13 = sadd.s32 4294967294, %s4259_s30  }
 0x71e   : > { %s2750_s11 = sand.u32 1, %s5285_s13  }
 0x71f   : > { %s2751_s16 = scalar_lea.sflag [#allocation19], %s2750_s11 }
 0x720   : > { %4242 = dma.done.wait (!%p3544_p7), %s2751_s16, 4096  }
 0x721   : > { %4244 = vsyncadd (!%p3544_p7), %s2751_s16, 4294963200  ;;  %p41_p10 = scmp.ge.s32.totalorder %s4592_s24, 4   ;;  %s5286_s27 = smov %s4251_s28 }
 0x722   : > { %s5287_s28 = smov %s4255_s29  ;;  %s5288_s29 = smov %s4604_s2 }
 0x723   : > { %s5289_s30 = smov %s4592_s24  ;;  %43 = sbr.rel (!%p41_p10) target bundleno = 30 (0x1e), region = 202 }
 0x72a   :  { %2765 = vsyncpa [#allocation3], 1 }
 0x72b   :  { %2767 = vsyncpa [#allocation3 + $0x1], 1 }
 0x72c   :  { %2768 = vsyncpa [#allocation6], 1 }
 0x72d   :  { %2770 = vsyncpa [#allocation6 + $0x1], 1 }
 0x72e   :  { %2771 = vsyncpa [#allocation9], 1 }
 0x72f   :  { %2772 = vsyncpa [#allocation12], 1 }
 0x730   :  { %2773 = vsyncpa [#allocation15], 1 }
 0x731   :  { %2774 = vsyncpa [#allocation4], 1 }
 0x732   :  { %2776 = vsyncpa [#allocation4 + $0x1], 1 }
 0x733   :  { %2777 = vsyncpa [#allocation19], 1 }
 0x734   :  { %2779 = vsyncpa [#allocation19 + $0x1], 1 }

</bundles_post_ra>
